<compile_context>
chip_gen: v5e
topology: v5e:2x2
jax: 0.10.0
libtpu: 0.0.40
codegen_flags: <defaults>
</compile_context>

<pallas_src>
import functools

import numpy as np
import jax
import jax.numpy as jnp
from jax import lax
from jax.experimental import pallas as pl
from jax.experimental.pallas import tpu as pltpu


def _round_up(x, m):
    return (x + m - 1) // m * m


# -----------------------------------------------------------------------------
# Pallas kernel: one direction of a BiLSTM, one time-chunk per grid step.
# Grid = (direction, time_chunk); direction is "parallel", chunks "arbitrary".
# -----------------------------------------------------------------------------
def _bilstm_kernel(x_ref, h0_ref, c0_ref, wih_ref, whh_ref, b_ref,
                   out_ref, hn_ref, cn_ref,
                   gx_ref, h_ref, c_ref, *, seq_len):
    # x_ref:   (CT*Bp, Ep)  this direction's time-chunk, rows = (t, b) flattened
    # h0/c0:   (Bp, Hp)     initial state for this direction
    # wih_ref: (Ep, 4Hp)    input->gates weights, gate order (i, f, o, g)
    # whh_ref: (Hp, 4Hp)    hidden->gates weights
    # b_ref:   (1, 4Hp)     combined bias b_ih + b_hh
    # out_ref: (CT*Bp, Hp)  per-step hidden states for this chunk
    # hn/cn:   (Bp, Hp)     final state (written at the last chunk)
    # gx_ref:  (CT*Bp, 4Hp) scratch: hoisted input-projection pre-activations
    # h_ref/c_ref: (Bp, Hp) scratch: recurrent carry across chunks
    d = pl.program_id(0)              # 0 = forward, 1 = backward
    chunk = pl.program_id(1)
    nchunks = pl.num_programs(1)
    Bp, Hp = h0_ref.shape
    CT = x_ref.shape[0] // Bp

    # Initialize the carry at the first chunk of this direction.
    @pl.when(chunk == 0)
    def _():
        h_ref[...] = h0_ref[...]
        c_ref[...] = c0_ref[...]

    # Hoisted input projection: one large MXU matmul for the whole chunk
    # (CT*Bp rows) instead of CT tiny per-step matmuls; bias folded in.
    gx_ref[...] = (jnp.dot(x_ref[...], wih_ref[...],
                           preferred_element_type=jnp.float32) + b_ref[...])

    whh = whh_ref[...]
    # Backward direction walks chunks and in-chunk steps in reversed time.
    time_chunk = (1 - d) * chunk + d * (nchunks - 1 - chunk)
    t_base = time_chunk * CT

    h = h_ref[...]
    c = c_ref[...]
    # Fully unrolled chunk recurrence (CT is a small static Python int) so the
    # scheduler can overlap one step's h@W_hh with the previous step's EUP/VPU.
    for s in range(CT):
        lt = (1 - d) * s + d * (CT - 1 - s)        # local time index in chunk
        r0 = pl.multiple_of(lt * Bp, Bp)           # sublane-aligned row offset
        gates = gx_ref[pl.ds(r0, Bp), :] + jnp.dot(
            h, whh, preferred_element_type=jnp.float32)          # (Bp, 4Hp)
        # Gate order (i, f, o, g): one sigmoid over 3*Hp lanes, one tanh.
        sig = jax.nn.sigmoid(gates[:, :3 * Hp])
        g_t = jnp.tanh(gates[:, 3 * Hp:])
        i_t = sig[:, :Hp]
        f_t = sig[:, Hp:2 * Hp]
        o_t = sig[:, 2 * Hp:3 * Hp]
        c_new = f_t * c + i_t * g_t
        h_new = o_t * jnp.tanh(c_new)
        # Mask padded time steps (global t >= seq_len) so they never advance
        # the recurrent state (matters for the backward direction, which sees
        # the padded tail first).
        m = ((t_base + lt) < seq_len).astype(jnp.float32)
        h = h + m * (h_new - h)
        c = c + m * (c_new - c)
        out_ref[pl.ds(r0, Bp), :] = h              # dense (8, 128) store
    h_ref[...] = h
    c_ref[...] = c

    @pl.when(chunk == nchunks - 1)
    def _():
        hn_ref[...] = h
        cn_ref[...] = c


def bilstm_pallas(x2d, h0p, c0p, wih_k, whh_k, b_k, *, seq_len, chunk_t):
    # x2d: (Tp*Bp, Ep); h0p/c0p: (2, Bp, Hp); wih_k: (2, Ep, 4Hp);
    # whh_k: (2, Hp, 4Hp); b_k: (2, 1, 4Hp)
    TpBp, Ep = x2d.shape
    _, Bp, Hp = h0p.shape
    H4 = whh_k.shape[-1]
    CTB = chunk_t * Bp
    nchunks = TpBp // CTB

    def time_block(d, i):
        # Forward consumes chunks 0..N-1, backward consumes N-1..0.
        return (1 - d) * i + d * (nchunks - 1 - i)

    def dir_only(d, i):
        return (d, 0, 0)

    return pl.pallas_call(
        functools.partial(_bilstm_kernel, seq_len=seq_len),
        grid=(2, nchunks),
        in_specs=[
            pl.BlockSpec((CTB, Ep), lambda d, i: (time_block(d, i), 0)),   # x chunk
            pl.BlockSpec((None, Bp, Hp), dir_only),                        # h0
            pl.BlockSpec((None, Bp, Hp), dir_only),                        # c0
            pl.BlockSpec((None, Ep, H4), dir_only),                        # W_ih
            pl.BlockSpec((None, Hp, H4), dir_only),                        # W_hh
            pl.BlockSpec((None, 1, H4), dir_only),                         # bias
        ],
        out_specs=(
            pl.BlockSpec((None, CTB, Hp), lambda d, i: (d, time_block(d, i), 0)),
            pl.BlockSpec((None, Bp, Hp), dir_only),                        # h_n
            pl.BlockSpec((None, Bp, Hp), dir_only),                        # c_n
        ),
        out_shape=(
            jax.ShapeDtypeStruct((2, TpBp, Hp), jnp.float32),
            jax.ShapeDtypeStruct((2, Bp, Hp), jnp.float32),
            jax.ShapeDtypeStruct((2, Bp, Hp), jnp.float32),
        ),
        scratch_shapes=[
            pltpu.VMEM((CTB, H4), jnp.float32),   # hoisted x@W_ih pre-activations
            pltpu.VMEM((Bp, Hp), jnp.float32),    # h carry across chunks
            pltpu.VMEM((Bp, Hp), jnp.float32),    # c carry across chunks
        ],
        compiler_params=pltpu.CompilerParams(
            dimension_semantics=("parallel", "arbitrary"),
            vmem_limit_bytes=32 * 1024 * 1024),
    )(x2d, h0p, c0p, wih_k, whh_k, b_k)


# -----------------------------------------------------------------------------
# Parameter init + kernel-layout weight preparation (done once, XLA glue).
# -----------------------------------------------------------------------------
def _prepare_kernel_weights(w_ih, w_hh, b_ih, b_hh, Ep, Hp):
    """PyTorch layout (2, 4H, in), gate rows (i,f,g,o) -> kernel layout:
    pre-transposed (2, in_pad, 4Hp) with gate columns (i,f,o,g), zero-padded."""
    H = w_hh.shape[-1]
    E = w_ih.shape[-1]
    order = (0, 1, 3, 2)   # (i, f, g, o) -> (i, f, o, g)

    def pack_w(w, in_dim, in_pad):
        blocks = []
        for k in order:
            g = w[:, k * H:(k + 1) * H, :]                 # (2, H, in_dim)
            g = jnp.transpose(g, (0, 2, 1))                # (2, in_dim, H)
            g = jnp.pad(g, ((0, 0), (0, in_pad - in_dim), (0, Hp - H)))
            blocks.append(g)
        return jnp.concatenate(blocks, axis=-1)            # (2, in_pad, 4Hp)

    def pack_b(b):                                         # (2, 4H) -> (2, 1, 4Hp)
        blocks = [jnp.pad(b[:, k * H:(k + 1) * H], ((0, 0), (0, Hp - H)))
                  for k in order]
        return jnp.concatenate(blocks, axis=-1)[:, None, :]

    return pack_w(w_ih, E, Ep), pack_w(w_hh, H, Hp), pack_b(b_ih + b_hh)


def init_encoder_params(key, vocabulary_size, embedding_size, hidden_size):
    V, E, H = vocabulary_size, embedding_size, hidden_size
    k_emb, k_wi, k_wh, k_bi, k_bh = jax.random.split(key, 5)
    bound = 1.0 / np.sqrt(H)
    # nn.Embedding: N(0,1) init, padding_idx=0 row zeroed.
    emb = jax.random.normal(k_emb, (V, E), dtype=jnp.float32)
    emb = emb.at[0].set(0.0)
    # nn.LSTM: U(-1/sqrt(H), 1/sqrt(H)), two directions, PyTorch gate order.
    w_ih = jax.random.uniform(k_wi, (2, 4 * H, E), jnp.float32, -bound, bound)
    w_hh = jax.random.uniform(k_wh, (2, 4 * H, H), jnp.float32, -bound, bound)
    b_ih = jax.random.uniform(k_bi, (2, 4 * H), jnp.float32, -bound, bound)
    b_hh = jax.random.uniform(k_bh, (2, 4 * H), jnp.float32, -bound, bound)

    Ep, Hp = _round_up(E, 128), _round_up(H, 128)
    wih_k, whh_k, b_k = _prepare_kernel_weights(w_ih, w_hh, b_ih, b_hh, Ep, Hp)
    return {
        # original (PyTorch-layout) params, used by the pure-JAX reference
        "embedding": emb, "w_ih": w_ih, "w_hh": w_hh, "b_ih": b_ih, "b_hh": b_hh,
        # kernel-layout params (reordered, transposed, lane/sublane padded)
        "wih_k": wih_k, "whh_k": whh_k, "b_k": b_k,
    }


# -----------------------------------------------------------------------------
# Encoder forward (wrapper glue) — mirrors Encoder.forward.
# -----------------------------------------------------------------------------
def encoder_forward(params, inputs, hidden_states, *, chunk_t=4):
    """inputs: (B, T) int tokens; hidden_states = (h, c) each (2, B, H)."""
    h0, c0 = hidden_states
    B, T = inputs.shape
    H = h0.shape[-1]
    # TODO(synk): embedding row-gather stays in XLA; a Pallas DMA gather is
    # possible but not worthwhile at this size.  Dropout(p=0.0) is identity.
    emb = params["embedding"][inputs]                    # (B, T, E)
    E = emb.shape[-1]

    Ep = params["wih_k"].shape[1]
    Hp = params["whh_k"].shape[1]
    Bp = max(8, _round_up(B, 8))
    Tp = _round_up(T, chunk_t)

    # Time-major, padded to (sublane=8, lane=128)-friendly sizes, flattened to
    # 2-D so every per-step kernel load/store is a full (8, 128) tile.
    x = jnp.transpose(emb, (1, 0, 2))                    # (T, B, E)
    x = jnp.pad(x, ((0, Tp - T), (0, Bp - B), (0, Ep - E)))
    x2d = x.reshape(Tp * Bp, Ep)

    def pad_state(s):   # zero padding keeps padded lanes inert in the recurrence
        return jnp.pad(s, ((0, 0), (0, Bp - B), (0, Hp - H)))

    out2d, h_n, c_n = bilstm_pallas(
        x2d, pad_state(h0), pad_state(c0),
        params["wih_k"], params["whh_k"], params["b_k"],
        seq_len=T, chunk_t=chunk_t)

    out = out2d.reshape(2, Tp, Bp, Hp)[:, :T, :B, :H]    # (2, T, B, H)
    output = jnp.concatenate([out[0], out[1]], axis=-1)  # (T, B, 2H)
    output = jnp.transpose(output, (1, 0, 2))            # (B, T, 2H)
    return output, (h_n[:, :B, :H], c_n[:, :B, :H])


def initial_states(batch_size, hidden_size):
    h0 = jnp.zeros((2, batch_size, hidden_size), jnp.float32)
    return h0, h0


# -----------------------------------------------------------------------------
# Pure-JAX reference (PyTorch layout / gate order, full precision matmuls).
# -----------------------------------------------------------------------------
def encoder_ref(params, inputs, hidden_states):
    h0, c0 = hidden_states
    emb = params["embedding"][inputs]                    # (B, T, E)
    B, T, _ = emb.shape
    H = h0.shape[-1]
    hi = lax.Precision.HIGHEST

    def cell(x_t, h, c, w_ih, w_hh, b):
        gates = (jnp.dot(x_t, w_ih.T, precision=hi)
                 + jnp.dot(h, w_hh.T, precision=hi) + b)
        i = jax.nn.sigmoid(gates[:, :H])
        f = jax.nn.sigmoid(gates[:, H:2 * H])
        g = jnp.tanh(gates[:, 2 * H:3 * H])
        o = jax.nn.sigmoid(gates[:, 3 * H:])
        c = f * c + i * g
        h = o * jnp.tanh(c)
        return h, c

    bf = params["b_ih"][0] + params["b_hh"][0]
    bb = params["b_ih"][1] + params["b_hh"][1]

    hf, cf = h0[0], c0[0]
    outs_f = []
    for t in range(T):
        hf, cf = cell(emb[:, t], hf, cf, params["w_ih"][0], params["w_hh"][0], bf)
        outs_f.append(hf)

    hb, cb = h0[1], c0[1]
    outs_b = [None] * T
    for t in range(T - 1, -1, -1):
        hb, cb = cell(emb[:, t], hb, cb, params["w_ih"][1], params["w_hh"][1], bb)
        outs_b[t] = hb

    out = jnp.stack(
        [jnp.concatenate([outs_f[t], outs_b[t]], axis=-1) for t in range(T)],
        axis=1)                                          # (B, T, 2H)
    return out, (jnp.stack([hf, hb]), jnp.stack([cf, cb]))


# -----------------------------------------------------------------------------
if __name__ == "__main__":
    # Small shapes consistent with the module's forward contract.
    VOCAB, EMB, HID = 64, 32, 32
    BATCH, SEQ = 2, 10      # SEQ deliberately NOT a multiple of the time chunk

    key = jax.random.PRNGKey(0)
    k_params, k_tok = jax.random.split(key)

    params = init_encoder_params(k_params, VOCAB, EMB, HID)
    tokens = jax.random.randint(k_tok, (BATCH, SEQ), 0, VOCAB, dtype=jnp.int32)
    hidden0 = initial_states(BATCH, HID)

    fwd = jax.jit(encoder_forward)
    out, (h_n, c_n) = fwd(params, tokens, hidden0)
    jax.block_until_ready((out, h_n, c_n))

    assert out.shape == (BATCH, SEQ, 2 * HID)
    assert h_n.shape == (2, BATCH, HID) and c_n.shape == (2, BATCH, HID)

    # Correctness vs. pure-JAX reference (loose tolerance documents the
    # default-precision MXU passes in the kernel vs. HIGHEST in the reference).
    out_r, (h_r, c_r) = encoder_ref(params, tokens, hidden0)
    np.testing.assert_allclose(np.asarray(out), np.asarray(out_r), atol=5e-3, rtol=5e-3)
    np.testing.assert_allclose(np.asarray(h_n), np.asarray(h_r), atol=5e-3, rtol=5e-3)
    np.testing.assert_allclose(np.asarray(c_n), np.asarray(c_r), atol=5e-3, rtol=5e-3)

    print("KERNEL_OK")
</pallas_src>

<mosaic_0001>
module attributes {stable_mosaic.version = 11 : i64} {
  func.func @_bilstm_kernel(%arg0: i32, %arg1: i32, %arg2: memref<32x128xf32, #tpu.memory_space<vmem>>, %arg3: memref<1x8x128xf32, #tpu.memory_space<vmem>>, %arg4: memref<1x8x128xf32, #tpu.memory_space<vmem>>, %arg5: memref<1x128x512xf32, #tpu.memory_space<vmem>>, %arg6: memref<1x128x512xf32, #tpu.memory_space<vmem>>, %arg7: memref<1x1x512xf32, #tpu.memory_space<vmem>>, %arg8: memref<1x32x128xf32, #tpu.memory_space<vmem>>, %arg9: memref<1x8x128xf32, #tpu.memory_space<vmem>>, %arg10: memref<1x8x128xf32, #tpu.memory_space<vmem>>, %arg11: memref<32x512xf32, #tpu.memory_space<vmem>>, %arg12: memref<8x128xf32, #tpu.memory_space<vmem>>, %arg13: memref<8x128xf32, #tpu.memory_space<vmem>>) attributes {dimension_semantics = [#tpu.dimension_semantics<parallel>, #tpu.dimension_semantics<arbitrary>], iteration_bounds = array<i64: 2, 3>, scalar_prefetch = 0 : i64, scratch_operands = 3 : i64, tpu.core_type = #tpu.core_type<tc>, window_params = [{transform_indices = @transform_0, window_bounds = array<i64: 32, 128>}, {transform_indices = @transform_1, window_bounds = array<i64: 1, 8, 128>}, {transform_indices = @transform_2, window_bounds = array<i64: 1, 8, 128>}, {transform_indices = @transform_3, window_bounds = array<i64: 1, 128, 512>}, {transform_indices = @transform_4, window_bounds = array<i64: 1, 128, 512>}, {transform_indices = @transform_5, window_bounds = array<i64: 1, 1, 512>}, {transform_indices = @transform_6, window_bounds = array<i64: 1, 32, 128>}, {transform_indices = @transform_7, window_bounds = array<i64: 1, 8, 128>}, {transform_indices = @transform_8, window_bounds = array<i64: 1, 8, 128>}]} {
    %c0_i32 = arith.constant 0 : i32
    %0 = arith.cmpi eq, %arg1, %c0_i32 : i32
    %1 = arith.extui %0 : i1 to i32
    %c0_i32_0 = arith.constant 0 : i32
    %2 = arith.cmpi ne, %1, %c0_i32_0 : i32
    scf.if %2 {
      %c0_60 = arith.constant 0 : index
      %c0_61 = arith.constant 0 : index
      %c0_62 = arith.constant 0 : index
      %195 = vector.load %arg3[%c0_60, %c0_61, %c0_62] : memref<1x8x128xf32, #tpu.memory_space<vmem>>, vector<1x8x128xf32>
      %196 = vector.shape_cast %195 : vector<1x8x128xf32> to vector<8x128xf32>
      %c0_63 = arith.constant 0 : index
      %c0_64 = arith.constant 0 : index
      %197 = vector.load %arg12[%c0_63, %c0_64] : memref<8x128xf32, #tpu.memory_space<vmem>>, vector<8x128xf32>
      tpu.vector_store %arg12[%c0_63, %c0_64], %196 {strides = array<i32>} : memref<8x128xf32, #tpu.memory_space<vmem>>, vector<8x128xf32>,
      %c0_65 = arith.constant 0 : index
      %c0_66 = arith.constant 0 : index
      %c0_67 = arith.constant 0 : index
      %198 = vector.load %arg4[%c0_65, %c0_66, %c0_67] : memref<1x8x128xf32, #tpu.memory_space<vmem>>, vector<1x8x128xf32>
      %199 = vector.shape_cast %198 : vector<1x8x128xf32> to vector<8x128xf32>
      %c0_68 = arith.constant 0 : index
      %c0_69 = arith.constant 0 : index
      %200 = vector.load %arg13[%c0_68, %c0_69] : memref<8x128xf32, #tpu.memory_space<vmem>>, vector<8x128xf32>
      tpu.vector_store %arg13[%c0_68, %c0_69], %199 {strides = array<i32>} : memref<8x128xf32, #tpu.memory_space<vmem>>, vector<8x128xf32>,
    } else {
    }
    %c0 = arith.constant 0 : index
    %c0_1 = arith.constant 0 : index
    %3 = vector.load %arg2[%c0, %c0_1] : memref<32x128xf32, #tpu.memory_space<vmem>>, vector<32x128xf32>
    %c0_2 = arith.constant 0 : index
    %c0_3 = arith.constant 0 : index
    %c0_4 = arith.constant 0 : index
    %4 = vector.load %arg5[%c0_2, %c0_3, %c0_4] : memref<1x128x512xf32, #tpu.memory_space<vmem>>, vector<1x128x512xf32>
    %5 = vector.shape_cast %4 : vector<1x128x512xf32> to vector<128x512xf32>
    %cst = arith.constant dense<0.000000e+00> : vector<32x512xf32>
    %6 = tpu.matmul %3, %5, %cst {dimension_numbers = #tpu.dot_dimension_numbers<[1], [0], [0], [1], [0, 0, 1, 1], [], []>} : vector<32x128xf32>, vector<128x512xf32>, vector<32x512xf32> -> vector<32x512xf32>
    %c0_5 = arith.constant 0 : index
    %c0_6 = arith.constant 0 : index
    %c0_7 = arith.constant 0 : index
    %7 = vector.load %arg7[%c0_5, %c0_6, %c0_7] : memref<1x1x512xf32, #tpu.memory_space<vmem>>, vector<1x1x512xf32>
    %8 = vector.shape_cast %7 : vector<1x1x512xf32> to vector<1x512xf32>
    %9 = vector.broadcast %8 : vector<1x512xf32> to vector<32x512xf32>
    %10 = arith.addf %6, %9 : vector<32x512xf32>
    %c0_8 = arith.constant 0 : index
    %c0_9 = arith.constant 0 : index
    %11 = vector.load %arg11[%c0_8, %c0_9] : memref<32x512xf32, #tpu.memory_space<vmem>>, vector<32x512xf32>
    tpu.vector_store %arg11[%c0_8, %c0_9], %10 {strides = array<i32>} : memref<32x512xf32, #tpu.memory_space<vmem>>, vector<32x512xf32>,
    %c0_10 = arith.constant 0 : index
    %c0_11 = arith.constant 0 : index
    %c0_12 = arith.constant 0 : index
    %12 = vector.load %arg6[%c0_10, %c0_11, %c0_12] : memref<1x128x512xf32, #tpu.memory_space<vmem>>, vector<1x128x512xf32>
    %13 = vector.shape_cast %12 : vector<1x128x512xf32> to vector<128x512xf32>
    %c1_i32 = arith.constant 1 : i32
    %14 = arith.subi %c1_i32, %arg0 : i32
    %15 = arith.muli %14, %arg1 : i32
    %c2_i32 = arith.constant 2 : i32
    %16 = arith.subi %c2_i32, %arg1 : i32
    %17 = arith.muli %arg0, %16 : i32
    %18 = arith.addi %15, %17 : i32
    %c4_i32 = arith.constant 4 : i32
    %19 = arith.muli %18, %c4_i32 : i32
    %c0_13 = arith.constant 0 : index
    %c0_14 = arith.constant 0 : index
    %20 = vector.load %arg12[%c0_13, %c0_14] : memref<8x128xf32, #tpu.memory_space<vmem>>, vector<8x128xf32>
    %c0_15 = arith.constant 0 : index
    %c0_16 = arith.constant 0 : index
    %21 = vector.load %arg13[%c0_15, %c0_16] : memref<8x128xf32, #tpu.memory_space<vmem>>, vector<8x128xf32>
    %c1_i32_17 = arith.constant 1 : i32
    %22 = arith.subi %c1_i32_17, %arg0 : i32
    %c0_i32_18 = arith.constant 0 : i32
    %23 = arith.muli %22, %c0_i32_18 : i32
    %c3_i32 = arith.constant 3 : i32
    %24 = arith.muli %arg0, %c3_i32 : i32
    %25 = arith.addi %23, %24 : i32
    %c8_i32 = arith.constant 8 : i32
    %26 = arith.muli %25, %c8_i32 : i32
    %27 = tpu.assume_multiple %26, 8 : i32
    %28 = arith.index_cast %27 : i32 to index
    %c0_19 = arith.constant 0 : index
    %29 = vector.load %arg11[%28, %c0_19] : memref<32x512xf32, #tpu.memory_space<vmem>>, vector<8x512xf32>
    %cst_20 = arith.constant dense<0.000000e+00> : vector<8x512xf32>
    %30 = tpu.matmul %20, %13, %cst_20 {dimension_numbers = #tpu.dot_dimension_numbers<[1], [0], [0], [1], [0, 0, 1, 1], [], []>} : vector<8x128xf32>, vector<128x512xf32>, vector<8x512xf32> -> vector<8x512xf32>
    %31 = arith.addf %29, %30 : vector<8x512xf32>
    %32 = vector.extract_strided_slice %31 {offsets = [0, 0], sizes = [8, 384], strides = [1, 1]} : vector<8x512xf32> to vector<8x384xf32>
    %33 = arith.negf %32 : vector<8x384xf32>
    %34 = math.exp %33 : vector<8x384xf32>
    %cst_21 = arith.constant 1.000000e+00 : f32
    %35 = vector.broadcast %cst_21 : f32 to vector<8x384xf32>
    %36 = arith.addf %35, %34 : vector<8x384xf32>
    %37 = arith.divf %35, %36 : vector<8x384xf32>
    %38 = vector.extract_strided_slice %31 {offsets = [0, 384], sizes = [8, 128], strides = [1, 1]} : vector<8x512xf32> to vector<8x128xf32>
    %39 = math.tanh %38 : vector<8x128xf32>
    %40 = vector.extract_strided_slice %37 {offsets = [0, 0], sizes = [8, 128], strides = [1, 1]} : vector<8x384xf32> to vector<8x128xf32>
    %41 = vector.extract_strided_slice %37 {offsets = [0, 128], sizes = [8, 128], strides = [1, 1]} : vector<8x384xf32> to vector<8x128xf32>
    %42 = vector.extract_strided_slice %37 {offsets = [0, 256], sizes = [8, 128], strides = [1, 1]} : vector<8x384xf32> to vector<8x128xf32>
    %43 = arith.mulf %41, %21 : vector<8x128xf32>
    %44 = arith.mulf %40, %39 : vector<8x128xf32>
    %45 = arith.addf %43, %44 : vector<8x128xf32>
    %46 = math.tanh %45 : vector<8x128xf32>
    %47 = arith.mulf %42, %46 : vector<8x128xf32>
    %48 = arith.addi %19, %25 : i32
    %c10_i32 = arith.constant 10 : i32
    %49 = arith.cmpi slt, %48, %c10_i32 : i32
    %50 = arith.extui %49 : i1 to i32
    %51 = arith.sitofp %50 : i32 to f32
    %52 = arith.subf %47, %20 : vector<8x128xf32>
    %53 = vector.broadcast %51 : f32 to vector<8x128xf32>
    %54 = arith.mulf %53, %52 : vector<8x128xf32>
    %55 = arith.addf %20, %54 : vector<8x128xf32>
    %56 = arith.subf %45, %21 : vector<8x128xf32>
    %57 = vector.broadcast %51 : f32 to vector<8x128xf32>
    %58 = arith.mulf %57, %56 : vector<8x128xf32>
    %59 = arith.addf %21, %58 : vector<8x128xf32>
    %c0_22 = arith.constant 0 : index
    %60 = arith.index_cast %27 : i32 to index
    %c0_23 = arith.constant 0 : index
    %61 = vector.load %arg8[%c0_22, %60, %c0_23] : memref<1x32x128xf32, #tpu.memory_space<vmem>>, vector<1x8x128xf32>
    %62 = vector.shape_cast %61 : vector<1x8x128xf32> to vector<8x128xf32>
    %63 = vector.shape_cast %55 : vector<8x128xf32> to vector<1x8x128xf32>
    tpu.vector_store %arg8[%c0_22, %60, %c0_23], %63 {strides = array<i32>} : memref<1x32x128xf32, #tpu.memory_space<vmem>>, vector<1x8x128xf32>,
    %c1_i32_24 = arith.constant 1 : i32
    %64 = arith.subi %c1_i32_24, %arg0 : i32
    %c1_i32_25 = arith.constant 1 : i32
    %65 = arith.muli %64, %c1_i32_25 : i32
    %c2_i32_26 = arith.constant 2 : i32
    %66 = arith.muli %arg0, %c2_i32_26 : i32
    %67 = arith.addi %65, %66 : i32
    %c8_i32_27 = arith.constant 8 : i32
    %68 = arith.muli %67, %c8_i32_27 : i32
    %69 = tpu.assume_multiple %68, 8 : i32
    %70 = arith.index_cast %69 : i32 to index
    %c0_28 = arith.constant 0 : index
    %71 = vector.load %arg11[%70, %c0_28] : memref<32x512xf32, #tpu.memory_space<vmem>>, vector<8x512xf32>
    %cst_29 = arith.constant dense<0.000000e+00> : vector<8x512xf32>
    %72 = tpu.matmul %55, %13, %cst_29 {dimension_numbers = #tpu.dot_dimension_numbers<[1], [0], [0], [1], [0, 0, 1, 1], [], []>} : vector<8x128xf32>, vector<128x512xf32>, vector<8x512xf32> -> vector<8x512xf32>
    %73 = arith.addf %71, %72 : vector<8x512xf32>
    %74 = vector.extract_strided_slice %73 {offsets = [0, 0], sizes = [8, 384], strides = [1, 1]} : vector<8x512xf32> to vector<8x384xf32>
    %75 = arith.negf %74 : vector<8x384xf32>
    %76 = math.exp %75 : vector<8x384xf32>
    %cst_30 = arith.constant 1.000000e+00 : f32
    %77 = vector.broadcast %cst_30 : f32 to vector<8x384xf32>
    %78 = arith.addf %77, %76 : vector<8x384xf32>
    %79 = arith.divf %77, %78 : vector<8x384xf32>
    %80 = vector.extract_strided_slice %73 {offsets = [0, 384], sizes = [8, 128], strides = [1, 1]} : vector<8x512xf32> to vector<8x128xf32>
    %81 = math.tanh %80 : vector<8x128xf32>
    %82 = vector.extract_strided_slice %79 {offsets = [0, 0], sizes = [8, 128], strides = [1, 1]} : vector<8x384xf32> to vector<8x128xf32>
    %83 = vector.extract_strided_slice %79 {offsets = [0, 128], sizes = [8, 128], strides = [1, 1]} : vector<8x384xf32> to vector<8x128xf32>
    %84 = vector.extract_strided_slice %79 {offsets = [0, 256], sizes = [8, 128], strides = [1, 1]} : vector<8x384xf32> to vector<8x128xf32>
    %85 = arith.mulf %83, %59 : vector<8x128xf32>
    %86 = arith.mulf %82, %81 : vector<8x128xf32>
    %87 = arith.addf %85, %86 : vector<8x128xf32>
    %88 = math.tanh %87 : vector<8x128xf32>
    %89 = arith.mulf %84, %88 : vector<8x128xf32>
    %90 = arith.addi %19, %67 : i32
    %c10_i32_31 = arith.constant 10 : i32
    %91 = arith.cmpi slt, %90, %c10_i32_31 : i32
    %92 = arith.extui %91 : i1 to i32
    %93 = arith.sitofp %92 : i32 to f32
    %94 = arith.subf %89, %55 : vector<8x128xf32>
    %95 = vector.broadcast %93 : f32 to vector<8x128xf32>
    %96 = arith.mulf %95, %94 : vector<8x128xf32>
    %97 = arith.addf %55, %96 : vector<8x128xf32>
    %98 = arith.subf %87, %59 : vector<8x128xf32>
    %99 = vector.broadcast %93 : f32 to vector<8x128xf32>
    %100 = arith.mulf %99, %98 : vector<8x128xf32>
    %101 = arith.addf %59, %100 : vector<8x128xf32>
    %c0_32 = arith.constant 0 : index
    %102 = arith.index_cast %69 : i32 to index
    %c0_33 = arith.constant 0 : index
    %103 = vector.load %arg8[%c0_32, %102, %c0_33] : memref<1x32x128xf32, #tpu.memory_space<vmem>>, vector<1x8x128xf32>
    %104 = vector.shape_cast %103 : vector<1x8x128xf32> to vector<8x128xf32>
    %105 = vector.shape_cast %97 : vector<8x128xf32> to vector<1x8x128xf32>
    tpu.vector_store %arg8[%c0_32, %102, %c0_33], %105 {strides = array<i32>} : memref<1x32x128xf32, #tpu.memory_space<vmem>>, vector<1x8x128xf32>,
    %c1_i32_34 = arith.constant 1 : i32
    %106 = arith.subi %c1_i32_34, %arg0 : i32
    %c2_i32_35 = arith.constant 2 : i32
    %107 = arith.muli %106, %c2_i32_35 : i32
    %c1_i32_36 = arith.constant 1 : i32
    %108 = arith.muli %arg0, %c1_i32_36 : i32
    %109 = arith.addi %107, %108 : i32
    %c8_i32_37 = arith.constant 8 : i32
    %110 = arith.muli %109, %c8_i32_37 : i32
    %111 = tpu.assume_multiple %110, 8 : i32
    %112 = arith.index_cast %111 : i32 to index
    %c0_38 = arith.constant 0 : index
    %113 = vector.load %arg11[%112, %c0_38] : memref<32x512xf32, #tpu.memory_space<vmem>>, vector<8x512xf32>
    %cst_39 = arith.constant dense<0.000000e+00> : vector<8x512xf32>
    %114 = tpu.matmul %97, %13, %cst_39 {dimension_numbers = #tpu.dot_dimension_numbers<[1], [0], [0], [1], [0, 0, 1, 1], [], []>} : vector<8x128xf32>, vector<128x512xf32>, vector<8x512xf32> -> vector<8x512xf32>
    %115 = arith.addf %113, %114 : vector<8x512xf32>
    %116 = vector.extract_strided_slice %115 {offsets = [0, 0], sizes = [8, 384], strides = [1, 1]} : vector<8x512xf32> to vector<8x384xf32>
    %117 = arith.negf %116 : vector<8x384xf32>
    %118 = math.exp %117 : vector<8x384xf32>
    %cst_40 = arith.constant 1.000000e+00 : f32
    %119 = vector.broadcast %cst_40 : f32 to vector<8x384xf32>
    %120 = arith.addf %119, %118 : vector<8x384xf32>
    %121 = arith.divf %119, %120 : vector<8x384xf32>
    %122 = vector.extract_strided_slice %115 {offsets = [0, 384], sizes = [8, 128], strides = [1, 1]} : vector<8x512xf32> to vector<8x128xf32>
    %123 = math.tanh %122 : vector<8x128xf32>
    %124 = vector.extract_strided_slice %121 {offsets = [0, 0], sizes = [8, 128], strides = [1, 1]} : vector<8x384xf32> to vector<8x128xf32>
    %125 = vector.extract_strided_slice %121 {offsets = [0, 128], sizes = [8, 128], strides = [1, 1]} : vector<8x384xf32> to vector<8x128xf32>
    %126 = vector.extract_strided_slice %121 {offsets = [0, 256], sizes = [8, 128], strides = [1, 1]} : vector<8x384xf32> to vector<8x128xf32>
    %127 = arith.mulf %125, %101 : vector<8x128xf32>
    %128 = arith.mulf %124, %123 : vector<8x128xf32>
    %129 = arith.addf %127, %128 : vector<8x128xf32>
    %130 = math.tanh %129 : vector<8x128xf32>
    %131 = arith.mulf %126, %130 : vector<8x128xf32>
    %132 = arith.addi %19, %109 : i32
    %c10_i32_41 = arith.constant 10 : i32
    %133 = arith.cmpi slt, %132, %c10_i32_41 : i32
    %134 = arith.extui %133 : i1 to i32
    %135 = arith.sitofp %134 : i32 to f32
    %136 = arith.subf %131, %97 : vector<8x128xf32>
    %137 = vector.broadcast %135 : f32 to vector<8x128xf32>
    %138 = arith.mulf %137, %136 : vector<8x128xf32>
    %139 = arith.addf %97, %138 : vector<8x128xf32>
    %140 = arith.subf %129, %101 : vector<8x128xf32>
    %141 = vector.broadcast %135 : f32 to vector<8x128xf32>
    %142 = arith.mulf %141, %140 : vector<8x128xf32>
    %143 = arith.addf %101, %142 : vector<8x128xf32>
    %c0_42 = arith.constant 0 : index
    %144 = arith.index_cast %111 : i32 to index
    %c0_43 = arith.constant 0 : index
    %145 = vector.load %arg8[%c0_42, %144, %c0_43] : memref<1x32x128xf32, #tpu.memory_space<vmem>>, vector<1x8x128xf32>
    %146 = vector.shape_cast %145 : vector<1x8x128xf32> to vector<8x128xf32>
    %147 = vector.shape_cast %139 : vector<8x128xf32> to vector<1x8x128xf32>
    tpu.vector_store %arg8[%c0_42, %144, %c0_43], %147 {strides = array<i32>} : memref<1x32x128xf32, #tpu.memory_space<vmem>>, vector<1x8x128xf32>,
    %c1_i32_44 = arith.constant 1 : i32
    %148 = arith.subi %c1_i32_44, %arg0 : i32
    %c3_i32_45 = arith.constant 3 : i32
    %149 = arith.muli %148, %c3_i32_45 : i32
    %c0_i32_46 = arith.constant 0 : i32
    %150 = arith.muli %arg0, %c0_i32_46 : i32
    %151 = arith.addi %149, %150 : i32
    %c8_i32_47 = arith.constant 8 : i32
    %152 = arith.muli %151, %c8_i32_47 : i32
    %153 = tpu.assume_multiple %152, 8 : i32
    %154 = arith.index_cast %153 : i32 to index
    %c0_48 = arith.constant 0 : index
    %155 = vector.load %arg11[%154, %c0_48] : memref<32x512xf32, #tpu.memory_space<vmem>>, vector<8x512xf32>
    %cst_49 = arith.constant dense<0.000000e+00> : vector<8x512xf32>
    %156 = tpu.matmul %139, %13, %cst_49 {dimension_numbers = #tpu.dot_dimension_numbers<[1], [0], [0], [1], [0, 0, 1, 1], [], []>} : vector<8x128xf32>, vector<128x512xf32>, vector<8x512xf32> -> vector<8x512xf32>
    %157 = arith.addf %155, %156 : vector<8x512xf32>
    %158 = vector.extract_strided_slice %157 {offsets = [0, 0], sizes = [8, 384], strides = [1, 1]} : vector<8x512xf32> to vector<8x384xf32>
    %159 = arith.negf %158 : vector<8x384xf32>
    %160 = math.exp %159 : vector<8x384xf32>
    %cst_50 = arith.constant 1.000000e+00 : f32
    %161 = vector.broadcast %cst_50 : f32 to vector<8x384xf32>
    %162 = arith.addf %161, %160 : vector<8x384xf32>
    %163 = arith.divf %161, %162 : vector<8x384xf32>
    %164 = vector.extract_strided_slice %157 {offsets = [0, 384], sizes = [8, 128], strides = [1, 1]} : vector<8x512xf32> to vector<8x128xf32>
    %165 = math.tanh %164 : vector<8x128xf32>
    %166 = vector.extract_strided_slice %163 {offsets = [0, 0], sizes = [8, 128], strides = [1, 1]} : vector<8x384xf32> to vector<8x128xf32>
    %167 = vector.extract_strided_slice %163 {offsets = [0, 128], sizes = [8, 128], strides = [1, 1]} : vector<8x384xf32> to vector<8x128xf32>
    %168 = vector.extract_strided_slice %163 {offsets = [0, 256], sizes = [8, 128], strides = [1, 1]} : vector<8x384xf32> to vector<8x128xf32>
    %169 = arith.mulf %167, %143 : vector<8x128xf32>
    %170 = arith.mulf %166, %165 : vector<8x128xf32>
    %171 = arith.addf %169, %170 : vector<8x128xf32>
    %172 = math.tanh %171 : vector<8x128xf32>
    %173 = arith.mulf %168, %172 : vector<8x128xf32>
    %174 = arith.addi %19, %151 : i32
    %c10_i32_51 = arith.constant 10 : i32
    %175 = arith.cmpi slt, %174, %c10_i32_51 : i32
    %176 = arith.extui %175 : i1 to i32
    %177 = arith.sitofp %176 : i32 to f32
    %178 = arith.subf %173, %139 : vector<8x128xf32>
    %179 = vector.broadcast %177 : f32 to vector<8x128xf32>
    %180 = arith.mulf %179, %178 : vector<8x128xf32>
    %181 = arith.addf %139, %180 : vector<8x128xf32>
    %182 = arith.subf %171, %143 : vector<8x128xf32>
    %183 = vector.broadcast %177 : f32 to vector<8x128xf32>
    %184 = arith.mulf %183, %182 : vector<8x128xf32>
    %185 = arith.addf %143, %184 : vector<8x128xf32>
    %c0_52 = arith.constant 0 : index
    %186 = arith.index_cast %153 : i32 to index
    %c0_53 = arith.constant 0 : index
    %187 = vector.load %arg8[%c0_52, %186, %c0_53] : memref<1x32x128xf32, #tpu.memory_space<vmem>>, vector<1x8x128xf32>
    %188 = vector.shape_cast %187 : vector<1x8x128xf32> to vector<8x128xf32>
    %189 = vector.shape_cast %181 : vector<8x128xf32> to vector<1x8x128xf32>
    tpu.vector_store %arg8[%c0_52, %186, %c0_53], %189 {strides = array<i32>} : memref<1x32x128xf32, #tpu.memory_space<vmem>>, vector<1x8x128xf32>,
    %c0_54 = arith.constant 0 : index
    %c0_55 = arith.constant 0 : index
    %190 = vector.load %arg12[%c0_54, %c0_55] : memref<8x128xf32, #tpu.memory_space<vmem>>, vector<8x128xf32>
    tpu.vector_store %arg12[%c0_54, %c0_55], %181 {strides = array<i32>} : memref<8x128xf32, #tpu.memory_space<vmem>>, vector<8x128xf32>,
    %c0_56 = arith.constant 0 : index
    %c0_57 = arith.constant 0 : index
    %191 = vector.load %arg13[%c0_56, %c0_57] : memref<8x128xf32, #tpu.memory_space<vmem>>, vector<8x128xf32>
    tpu.vector_store %arg13[%c0_56, %c0_57], %185 {strides = array<i32>} : memref<8x128xf32, #tpu.memory_space<vmem>>, vector<8x128xf32>,
    %c2_i32_58 = arith.constant 2 : i32
    %192 = arith.cmpi eq, %arg1, %c2_i32_58 : i32
    %193 = arith.extui %192 : i1 to i32
    %c0_i32_59 = arith.constant 0 : i32
    %194 = arith.cmpi ne, %193, %c0_i32_59 : i32
    scf.if %194 {
      %c0_60 = arith.constant 0 : index
      %c0_61 = arith.constant 0 : index
      %c0_62 = arith.constant 0 : index
      %195 = vector.load %arg9[%c0_60, %c0_61, %c0_62] : memref<1x8x128xf32, #tpu.memory_space<vmem>>, vector<1x8x128xf32>
      %196 = vector.shape_cast %195 : vector<1x8x128xf32> to vector<8x128xf32>
      %197 = vector.shape_cast %181 : vector<8x128xf32> to vector<1x8x128xf32>
      tpu.vector_store %arg9[%c0_60, %c0_61, %c0_62], %197 {strides = array<i32>} : memref<1x8x128xf32, #tpu.memory_space<vmem>>, vector<1x8x128xf32>,
      %c0_63 = arith.constant 0 : index
      %c0_64 = arith.constant 0 : index
      %c0_65 = arith.constant 0 : index
      %198 = vector.load %arg10[%c0_63, %c0_64, %c0_65] : memref<1x8x128xf32, #tpu.memory_space<vmem>>, vector<1x8x128xf32>
      %199 = vector.shape_cast %198 : vector<1x8x128xf32> to vector<8x128xf32>
      %200 = vector.shape_cast %185 : vector<8x128xf32> to vector<1x8x128xf32>
      tpu.vector_store %arg10[%c0_63, %c0_64, %c0_65], %200 {strides = array<i32>} : memref<1x8x128xf32, #tpu.memory_space<vmem>>, vector<1x8x128xf32>,
    } else {
    }
    return
  }
  func.func @transform_0(%arg0: i32, %arg1: i32) -> (i32, i32) {
    %c1_i32 = arith.constant 1 : i32
    %0 = arith.subi %c1_i32, %arg0 : i32
    %1 = arith.muli %0, %arg1 : i32
    %c2_i32 = arith.constant 2 : i32
    %2 = arith.subi %c2_i32, %arg1 : i32
    %3 = arith.muli %arg0, %2 : i32
    %4 = arith.addi %1, %3 : i32
    %c0_i32 = arith.constant 0 : i32
    %c0_i32_0 = arith.constant 0 : i32
    return %4, %c0_i32 : i32, i32
  }
  func.func @transform_1(%arg0: i32, %arg1: i32) -> (i32, i32, i32) {
    %c0_i32 = arith.constant 0 : i32
    %c0_i32_0 = arith.constant 0 : i32
    %c0_i32_1 = arith.constant 0 : i32
    return %arg0, %c0_i32, %c0_i32_0 : i32, i32, i32
  }
  func.func @transform_2(%arg0: i32, %arg1: i32) -> (i32, i32, i32) {
    %c0_i32 = arith.constant 0 : i32
    %c0_i32_0 = arith.constant 0 : i32
    %c0_i32_1 = arith.constant 0 : i32
    return %arg0, %c0_i32, %c0_i32_0 : i32, i32, i32
  }
  func.func @transform_3(%arg0: i32, %arg1: i32) -> (i32, i32, i32) {
    %c0_i32 = arith.constant 0 : i32
    %c0_i32_0 = arith.constant 0 : i32
    %c0_i32_1 = arith.constant 0 : i32
    return %arg0, %c0_i32, %c0_i32_0 : i32, i32, i32
  }
  func.func @transform_4(%arg0: i32, %arg1: i32) -> (i32, i32, i32) {
    %c0_i32 = arith.constant 0 : i32
    %c0_i32_0 = arith.constant 0 : i32
    %c0_i32_1 = arith.constant 0 : i32
    return %arg0, %c0_i32, %c0_i32_0 : i32, i32, i32
  }
  func.func @transform_5(%arg0: i32, %arg1: i32) -> (i32, i32, i32) {
    %c0_i32 = arith.constant 0 : i32
    %c0_i32_0 = arith.constant 0 : i32
    %c0_i32_1 = arith.constant 0 : i32
    return %arg0, %c0_i32, %c0_i32_0 : i32, i32, i32
  }
  func.func @transform_6(%arg0: i32, %arg1: i32) -> (i32, i32, i32) {
    %c1_i32 = arith.constant 1 : i32
    %0 = arith.subi %c1_i32, %arg0 : i32
    %1 = arith.muli %0, %arg1 : i32
    %c2_i32 = arith.constant 2 : i32
    %2 = arith.subi %c2_i32, %arg1 : i32
    %3 = arith.muli %arg0, %2 : i32
    %4 = arith.addi %1, %3 : i32
    %c0_i32 = arith.constant 0 : i32
    %c0_i32_0 = arith.constant 0 : i32
    return %arg0, %4, %c0_i32 : i32, i32, i32
  }
  func.func @transform_7(%arg0: i32, %arg1: i32) -> (i32, i32, i32) {
    %c0_i32 = arith.constant 0 : i32
    %c0_i32_0 = arith.constant 0 : i32
    %c0_i32_1 = arith.constant 0 : i32
    return %arg0, %c0_i32, %c0_i32_0 : i32, i32, i32
  }
  func.func @transform_8(%arg0: i32, %arg1: i32) -> (i32, i32, i32) {
    %c0_i32 = arith.constant 0 : i32
    %c0_i32_0 = arith.constant 0 : i32
    %c0_i32_1 = arith.constant 0 : i32
    return %arg0, %c0_i32, %c0_i32_0 : i32, i32, i32
  }
}

</mosaic_0001>

<bundles_post_ra>
// kernel: encoder_forward.1
= control target key start
LH: loop header
LB: loop body
LE: loop exit
PB: predicated region body
PF: predicated region fallthrough
CT: control target
= control target key end

     0   :  { %s2984_s0 = inlined_call_operand.vmem [shape: f32[96,128], index: 0, kind: input, shape index: {}]   ;;  %s2985_s1 = inlined_call_operand.vmem [shape: f32[2,8,128], index: 1, kind: input, shape index: {}]   ;;  %s2986_s2 = inlined_call_operand.vmem [shape: f32[2,8,128], index: 2, kind: input, shape index: {}]   ;;  %s2987_s3 = inlined_call_operand.hbm [shape: f32[2,128,512], index: 3, kind: input, shape index: {}]   ;;  %s2988_s4 = inlined_call_operand.hbm [shape: f32[2,128,512], index: 4, kind: input, shape index: {}]   ;;  %s2989_s5 = inlined_call_operand.vmem [shape: f32[2,1,512], index: 5, kind: input, shape index: {}]   ;;  %s2990_s6 = inlined_call_operand.vmem [shape: f32[2,96,128], index: 6, kind: output, shape index: {0}]   ;;  %s2991_s7 = inlined_call_operand.vmem [shape: f32[2,8,128], index: 7, kind: output, shape index: {1}]   ;;  %s2992_s8 = inlined_call_operand.vmem [shape: f32[2,8,128], index: 8, kind: output, shape index: {2}]  }
   0x1   :  { %3032 = sst [smem:[#allocation47_spill]] %s2985_s1 }
   0x2   :  { %3033 = sst [smem:[#allocation48_spill]] %s2986_s2 }
   0x3   :  { %3034 = sst [smem:[#allocation49_spill]] %s2987_s3 }
   0x4   :  { %3035 = sst [smem:[#allocation50_spill]] %s2988_s4 }
   0x5   :  { %14 = vsyncpa [#allocation6], 0 }
   0x6   :  { %16 = vsyncpa [#allocation6 + $0x1], 0 }
   0x7   :  { %17 = vsyncpa [#allocation8], 0 }
   0x8   :  { %19 = vsyncpa [#allocation8 + $0x1], 0  ;;  %s2173_s27 = smov 0   ;;  %s2175_s28 = smov 0  }
   0x9   :  { %s2177_s29 = smov 0   ;;  %s2179_s30 = smov 0  }
   0xa   :  { %s2181_s9 = smov 0   ;;  %s2183_s10 = smov 0  }
   0xb   :  { %s2185_s11 = smov 0   ;;  %s2187_s12 = smov 0  }
   0xc LB: > { %3036 = sst [smem:[#allocation11_spill]] %s2100_s28  ;;  %s1794_s13 = sadd.s32 4294967295, %s2124_s12   ;;  %s2124_s12 = sphi %s2187_s12, %s25_s12   ;;  %s2120_s11 = sphi %s2185_s11, %s3117_s11   ;;  %s2116_s10 = sphi %s2183_s10, %s3116_s10   ;;  %s2112_s9 = sphi %s2181_s9, %s3115_s9   ;;  %s2108_s30 = sphi %s2179_s30, %s3114_s30   ;;  %s2104_s29 = sphi %s2177_s29, %s3113_s29   ;;  %s2100_s28 = sphi %s2175_s28, %s3112_s28   ;;  %s2096_s27 = sphi %s2173_s27, %s3111_s27  }
   0xd   : > { %3037 = sst [smem:[#allocation12_spill]] %s2104_s29  ;;  %s34_s14 = sadd.s32 1, %s2116_s10 }
   0xe   : > { %3038 = sst [smem:[#allocation13_spill]] %s2116_s10  ;;  %p35_p0 = scmp.ge.s32.totalorder %s34_s14, 3 }
   0xf   : > { %3039 = sst [smem:[#allocation14_spill]] %s2120_s11  ;;  %s37_s15 = sadd.s32 1, %s2120_s11 }
  0x10   : > { %3040 = sst [smem:[#allocation15_spill]] %s2124_s12  ;;  %s132_s16 = sadd.s32 1, %s2104_s29 }
  0x11   : > { %p139_p1 = scmp.ne.s32.totalorder %s2104_s29, %s2100_s28  ;;  %s3119_s14 = smov (%p35_p0, %s34_s14), 0 }
  0x12   : > { %3041 = sst [smem:[#allocation16_spill]] %s3119_s14  ;;  %s3121_s15 = smov (!%p35_p0, %s37_s15), %s2120_s11 }
  0x13   : > { %p140_p2 = scmp.eq.s32.totalorder %s2124_s12, 0  ;;  %p145_p3 = scmp.ne.s32.totalorder %s2100_s28, %s2096_s27 }
  0x14   : > { %p39_p4 = scmp.ge.s32.totalorder %s3121_s15, 2  ;;  %p146_p5 = scmp.eq.s32.totalorder %s1794_s13, 0 }
  0x15   : > { %p2222_p6 = por %p140_p2, %p139_p1  ;;  %p1863_p8 = scmp.lt.s32.totalorder %s2124_s12, 6 }
  0x16   : > { %s3123_s15 = smov (%p39_p4, %s3121_s15), 0  ;;  %p2228_p7 = por %p146_p5, %p145_p3 }
  0x17   : > { %3043 = sst [smem:[#allocation17_spill]] %s3123_s15  ;;  %s129_s19 = ssub.s32 %s2120_s11, %s3123_s15 }
  0x18   : > { %s2236_s20 = sand.u32 1, %s2104_s29   ;;  %p130_p9 = scmp.eq.s32.totalorder %s129_s19, 0 }
  0x19   : > { %s1798_s21 = sshll.u32 %s2236_s20, 9  ;;  %s1845_s22 = sshll.u32 %s2120_s11, 9 }
  0x1a   : > { %s2241_s23 = scalar_select %p130_p9, %s2104_s29, %s132_s16  }
  0x1b   : > { %s3046_s3 = sld [smem:[#allocation49_spill]]  ;;  %s348_s13 = scalar_lea.vmem [#allocation5], %s1798_s21 }
  0x1c   : > { %3045 = sst [smem:[#allocation18_spill]] %s2241_s23  ;;  %s356_s14 = sshll.u32 %s348_s13, 4  ;;  %s357_s14 = int_to_ptr.vmem [resolvable:$true] %s356_s14 }
  0x1d   : > { %p2250_p10 = pnand %p1863_p8, %p2222_p6  ;;  %p1804_p11 = scmp.ge.s32.totalorder %s2124_s12, 1 }
  0x1e   : > { %p393_p12 = scmp.lt.s32.totalorder %s2124_s12, 7  ;;  %s345_s16 = scalar_lea.sflag [#allocation6], %s2236_s20 }
  0x1f   : > { %s2126_s19 = smov 512   ;;  %s2127_s24 = smov 32  }
  0x20   : > { %p394_p13 = pnand %p1804_p11, %p393_p12  ;;  %s3048_s4 = sld [smem:[#allocation50_spill]] }
  0x21   : > { %s353_s26 = scalar_lea.hbm %s3046_s3, %s1845_s22  ;;  %s370_s3 = scalar_lea.vmem [#allocation7], %s1798_s21 }
  0x22   : > { %s354_s27 = sshll.u32 %s353_s26, 4  ;;  %s378_s11 = sshll.u32 %s370_s3, 4  ;;  %s355_s27 = int_to_ptr.hbm [resolvable:$true] %s354_s27  ;;  %s379_s11 = int_to_ptr.vmem [resolvable:$true] %s378_s11 }
  0x23   : > { %1859 = dma.hbm_to_vmem [thread:$0]  (!%p2250_p10), %s355_s27, 8192, %s357_s14, %s345_s16, %s2126_s19, %s2126_s19, %s2127_s24  }
  0x24   : > { %s367_s10 = scalar_lea.sflag [#allocation8], %s2236_s20  ;;  %397 = sbr.rel (%p394_p13) target bundleno = 855 (0x357), region = 44 }
  0x26   : > { %s375_s13 = scalar_lea.hbm %s3048_s4, %s1845_s22 }
  0x27   : > { %s376_s17 = sshll.u32 %s375_s13, 4  ;;  %s377_s17 = int_to_ptr.hbm [resolvable:$true] %s376_s17 }
  0x28   : > { %1862 = dma.hbm_to_vmem [thread:$0]  (!%p2250_p10), %s377_s17, 8192, %s379_s11, %s367_s10, %s2126_s19, %s2126_s19, %s2127_s24  }
  0x29   : > { %s399_s23 = sand.u32 1, %s2100_s28  }
  0x2a   : > { %s1805_s29 = sshll.u32 %s399_s23, 9  ;;  %s400_s12 = scalar_lea.sflag [#allocation6], %s399_s23 }
  0x2b   : > { %s2266_s14 = scalar_lea.vmem [#allocation5], %s1805_s29 }
  0x2c   : > { %2087 = dma.done.wait (%p2228_p7), %s400_s12, 8192  }
  0x2d   : > { %2089 = vsyncadd (%p2228_p7), %s400_s12, 4294959104  ;;  %s410_s3 = scalar_lea.sflag [#allocation8], %s399_s23  ;;  %s2272_s21 = scalar_lea.vmem [#allocation7], %s1805_s29 }
  0x2e   : > { %2091 = dma.done.wait (%p2228_p7), %s410_s3, 8192  }
  0x2f   : > { %2093 = vsyncadd (%p2228_p7), %s410_s3, 4294959104  ;;  %s2279_s10 = ssub.s32 1, %s2112_s9  ;;  %s493_s11 = ssub.s32 2, %s2108_s30 }
  0x30   : > { %3049 = sst [smem:[#allocation19_spill]] %s2279_s10  ;;  %s492_s12 = smul.u32 %s2108_s30, %s2279_s10 }
  0x31   : > { %p507_p0 = scmp.lt.s32.totalorder %s2112_s9, 1  ;;  %s494_s15 = smul.u32 %s2112_s9, %s493_s11 }
  0x32   : > { %s3051_s1 = sld [smem:[#allocation47_spill]]  ;;  %p1816_p2 = scmp.ne.s32.totalorder %s2108_s30, 0 }
  0x33   : > { %s508_s29 = scalar_select %p507_p0, %s2112_s9, 1 }
  0x34   : > { %s495_s20 = sadd.s32 %s494_s15, %s492_s12  ;;  %s3052_s2 = sld [smem:[#allocation48_spill]] }
  0x35   : > { %s2287_s22 = sshll.u32 %s495_s20, 2  ;;  %s2289_s18 = sshll.u32 %s508_s29, 3 }
  0x36   : > { %3050 = sst [smem:[#allocation20_spill]] %s2287_s22  ;;  %p497_p1 = scmp.lt.s32.totalorder %s2287_s22, 11 }
  0x37   : > { %s1811_s26 = sshll.u32 %s508_s29, 2  ;;  %s1851_s12 = smul.u32 12, %s508_s29 }
  0x38   : > { %s510_s16 = scalar_lea.vmem %s3051_s1, %s2289_s18  ;;  %s2304_s11 = scalar_lea.vmem %s2989_s5, %s1811_s26 }
  0x39   : > { %s498_s13 = scalar_select %p497_p1, %s2287_s22, 11 }
  0x3a   : > { %s514_s25 = scalar_lea.vmem %s3052_s2, %s2289_s18  ;;  %s542_s28 = scalar_lea.vmem %s2991_s7, %s2289_s18 }
  0x3b   : > { %s1808_s15 = sshll.u32 %s498_s13, 3  ;;  %s530_s19 = sadd.s32 %s1851_s12, %s498_s13 }
  0x3c   : > { %s2313_s27 = scalar_lea.vmem %s2984_s0, %s1808_s15  ;;  %s1813_s24 = sshll.u32 %s530_s19, 3 }
  0x3d   : > { %s546_s22 = scalar_lea.vmem %s2992_s8, %s2289_s18  ;;  %s2322_s29 = scalar_lea.vmem %s2990_s6, %s1813_s24 }
  0x3e   : > { %550 = sbr.rel (%p1816_p2) target bundleno = 70 (0x46), region = 56 }
  0x43   : > { %v551_v0 = vld [vmem:[%s510_s16] sm:$0xff] }
  0x44   : > { %v553_v1 = vld [vmem:[%s514_s25] sm:$0xff]  ;;  %552 = vst [vmem:[#allocation3] sm:$0xff] %v551_v0 }
  0x45   : > { %554 = vst [vmem:[#allocation4] sm:$0xff] %v553_v1 }
  0x46 PF: > { %v621_v2 = vld [vmem:[%s2266_s14 + $0x1f0] sm:$0xff]  ;;  %v622_v3 = vld [vmem:[%s2266_s14 + $0x1f8] sm:$0xff]  ;;  %v619_v8 = vld [vmem:[%s2266_s14 + $0x1e0] sm:$0xff]  ;;  %s838_s1 = smul.u32 24, %s2112_s9  ;;  %s1823_s12 = sshll.u32 %s2112_s9, 1 }
  0x47   : > { %v617_v4 = vld [vmem:[%s2266_s14 + $0x1d0] sm:$0xff]  ;;  %691 = vmatpush.msra.mxu2 %v621_v2  ;;  %720 = vmatpush.msra.mxu3 %v622_v3  ;;  %v618_v5 = vld [vmem:[%s2266_s14 + $0x1d8] sm:$0xff]  ;;  %v620_v9 = vld [vmem:[%s2266_s14 + $0x1e8] sm:$0xff]  ;;  %s837_s10 = smul.u32 3, %s2112_s9  ;;  %p1842_p7 = scmp.ne.s32.totalorder %s2108_s30, 2 }
  0x48   : > { %v613_v6 = vld [vmem:[%s2266_s14 + $0x1b0] sm:$0xff]  ;;  %v614_v7 = vld [vmem:[%s2266_s14 + $0x1b8] sm:$0xff]  ;;  %v615_v10 = vld [vmem:[%s2266_s14 + $0x1c0] sm:$0xff]  ;;  %633 = vmatpush.msra.mxu0 %v619_v8  ;;  %662 = vmatpush.msra.mxu1 %v620_v9  ;;  %s839_s2 = sshra.s32 %s838_s1, 3  ;;  %s1006_s3 = scalar_lea.vmem %s2322_s29, %s838_s1 }
  0x49   : > { %692 = vmatpush.msra.mxu2 %v617_v4  ;;  %721 = vmatpush.msra.mxu3 %v618_v5  ;;  %v616_v11 = vld [vmem:[%s2266_s14 + $0x1c8] sm:$0xff]  ;;  %v609_v12 = vld [vmem:[%s2266_s14 + $0x190] sm:$0xff]  ;;  %v610_v13 = vld [vmem:[%s2266_s14 + $0x198] sm:$0xff]  ;;  %s1847_s4 = sshll.u32 %s839_s2, 5 }
  0x4a   : > { %v611_v14 = vld [vmem:[%s2266_s14 + $0x1a0] sm:$0xff]  ;;  %v612_v15 = vld [vmem:[%s2266_s14 + $0x1a8] sm:$0xff]  ;;  %634 = vmatpush.msra.mxu0 %v615_v10  ;;  %663 = vmatpush.msra.mxu1 %v616_v11  ;;  %v605_v16 = vld [vmem:[%s2266_s14 + $0x170] sm:$0xff] }
  0x4b   : > { %693 = vmatpush.msra.mxu2 %v613_v6  ;;  %722 = vmatpush.msra.mxu3 %v614_v7  ;;  %v606_v17 = vld [vmem:[%s2266_s14 + $0x178] sm:$0xff]  ;;  %v607_v18 = vld [vmem:[%s2266_s14 + $0x180] sm:$0xff]  ;;  %v608_v19 = vld [vmem:[%s2266_s14 + $0x188] sm:$0xff] }
  0x4c   : > { %635 = vmatpush.msra.mxu0 %v611_v14  ;;  %664 = vmatpush.msra.mxu1 %v612_v15  ;;  %v601_v20 = vld [vmem:[%s2266_s14 + $0x150] sm:$0xff]  ;;  %v602_v21 = vld [vmem:[%s2266_s14 + $0x158] sm:$0xff]  ;;  %v603_v22 = vld [vmem:[%s2266_s14 + $0x160] sm:$0xff] }
  0x4d   : > { %694 = vmatpush.msra.mxu2 %v609_v12  ;;  %723 = vmatpush.msra.mxu3 %v610_v13  ;;  %v604_v23 = vld [vmem:[%s2266_s14 + $0x168] sm:$0xff]  ;;  %v597_v24 = vld [vmem:[%s2266_s14 + $0x130] sm:$0xff]  ;;  %v598_v25 = vld [vmem:[%s2266_s14 + $0x138] sm:$0xff] }
  0x4e   : > { %636 = vmatpush.msra.mxu0 %v607_v18  ;;  %665 = vmatpush.msra.mxu1 %v608_v19  ;;  %v599_v26 = vld [vmem:[%s2266_s14 + $0x140] sm:$0xff]  ;;  %v600_v27 = vld [vmem:[%s2266_s14 + $0x148] sm:$0xff]  ;;  %v593_v28 = vld [vmem:[%s2266_s14 + $0x110] sm:$0xff] }
  0x4f   : > { %695 = vmatpush.msra.mxu2 %v605_v16  ;;  %724 = vmatpush.msra.mxu3 %v606_v17  ;;  %v594_v29 = vld [vmem:[%s2266_s14 + $0x118] sm:$0xff]  ;;  %v595_v30 = vld [vmem:[%s2266_s14 + $0x120] sm:$0xff]  ;;  %v596_v31 = vld [vmem:[%s2266_s14 + $0x128] sm:$0xff] }
  0x50   : > { %637 = vmatpush.msra.mxu0 %v603_v22  ;;  %666 = vmatpush.msra.mxu1 %v604_v23  ;;  %v589_v32 = vld [vmem:[%s2266_s14 + $0xf0] sm:$0xff]  ;;  %v590_v33 = vld [vmem:[%s2266_s14 + $0xf8] sm:$0xff]  ;;  %v591_v34 = vld [vmem:[%s2266_s14 + $0x100] sm:$0xff] }
  0x51   : > { %696 = vmatpush.msra.mxu2 %v601_v20  ;;  %725 = vmatpush.msra.mxu3 %v602_v21  ;;  %v592_v35 = vld [vmem:[%s2266_s14 + $0x108] sm:$0xff]  ;;  %v585_v36 = vld [vmem:[%s2266_s14 + $0xd0] sm:$0xff]  ;;  %v586_v37 = vld [vmem:[%s2266_s14 + $0xd8] sm:$0xff] }
  0x52   : > { %638 = vmatpush.msra.mxu0 %v599_v26  ;;  %667 = vmatpush.msra.mxu1 %v600_v27  ;;  %v587_v38 = vld [vmem:[%s2266_s14 + $0xe0] sm:$0xff]  ;;  %v588_v39 = vld [vmem:[%s2266_s14 + $0xe8] sm:$0xff]  ;;  %v581_v40 = vld [vmem:[%s2266_s14 + $0xb0] sm:$0xff] }
  0x53   : > { %697 = vmatpush.msra.mxu2 %v597_v24  ;;  %726 = vmatpush.msra.mxu3 %v598_v25  ;;  %v582_v41 = vld [vmem:[%s2266_s14 + $0xb8] sm:$0xff]  ;;  %v583_v42 = vld [vmem:[%s2266_s14 + $0xc0] sm:$0xff]  ;;  %v584_v43 = vld [vmem:[%s2266_s14 + $0xc8] sm:$0xff] }
  0x54   : > { %639 = vmatpush.msra.mxu0 %v595_v30  ;;  %668 = vmatpush.msra.mxu1 %v596_v31  ;;  %v577_v44 = vld [vmem:[%s2266_s14 + $0x90] sm:$0xff]  ;;  %v578_v45 = vld [vmem:[%s2266_s14 + $0x98] sm:$0xff]  ;;  %v579_v46 = vld [vmem:[%s2266_s14 + $0xa0] sm:$0xff] }
  0x55   : > { %698 = vmatpush.msra.mxu2 %v593_v28  ;;  %727 = vmatpush.msra.mxu3 %v594_v29  ;;  %v580_v47 = vld [vmem:[%s2266_s14 + $0xa8] sm:$0xff]  ;;  %v573_v48 = vld [vmem:[%s2266_s14 + $0x70] sm:$0xff]  ;;  %v574_v49 = vld [vmem:[%s2266_s14 + $0x78] sm:$0xff] }
  0x56   : > { %640 = vmatpush.msra.mxu0 %v591_v34  ;;  %669 = vmatpush.msra.mxu1 %v592_v35  ;;  %v575_v50 = vld [vmem:[%s2266_s14 + $0x80] sm:$0xff]  ;;  %v576_v51 = vld [vmem:[%s2266_s14 + $0x88] sm:$0xff]  ;;  %v569_v52 = vld [vmem:[%s2266_s14 + $0x50] sm:$0xff] }
  0x57   : > { %699 = vmatpush.msra.mxu2 %v589_v32  ;;  %728 = vmatpush.msra.mxu3 %v590_v33  ;;  %v570_v53 = vld [vmem:[%s2266_s14 + $0x58] sm:$0xff]  ;;  %v571_v54 = vld [vmem:[%s2266_s14 + $0x60] sm:$0xff]  ;;  %v572_v55 = vld [vmem:[%s2266_s14 + $0x68] sm:$0xff] }
  0x58   : > { %641 = vmatpush.msra.mxu0 %v587_v38  ;;  %670 = vmatpush.msra.mxu1 %v588_v39  ;;  %v565_v56 = vld [vmem:[%s2266_s14 + $0x30] sm:$0xff]  ;;  %v566_v57 = vld [vmem:[%s2266_s14 + $0x38] sm:$0xff]  ;;  %v567_v58 = vld [vmem:[%s2266_s14 + $0x40] sm:$0xff] }
  0x59   : > { %700 = vmatpush.msra.mxu2 %v585_v36  ;;  %729 = vmatpush.msra.mxu3 %v586_v37  ;;  %v568_v59 = vld [vmem:[%s2266_s14 + $0x48] sm:$0xff]  ;;  %v561_v60 = vld [vmem:[%s2266_s14 + $0x10] sm:$0xff]  ;;  %v562_v61 = vld [vmem:[%s2266_s14 + $0x18] sm:$0xff] }
  0x5a   : > { %642 = vmatpush.msra.mxu0 %v583_v42  ;;  %671 = vmatpush.msra.mxu1 %v584_v43  ;;  %v555_v62 = vld [vmem:[%s2313_s27] sm:$0xff]  ;;  %v563_v63 = vld [vmem:[%s2266_s14 + $0x20] sm:$0xff]  ;;  %v564_v0 = vld [vmem:[%s2266_s14 + $0x28] sm:$0xff] }
  0x5b   : > { %701 = vmatpush.msra.mxu2 %v581_v40  ;;  %730 = vmatpush.msra.mxu3 %v582_v41  ;;  %v2389_v1 = vld [vmem:[%s2272_s21 + $0x1f0] sm:$0xff]  ;;  %v2392_v2 = vld [vmem:[%s2272_s21 + $0x1f8] sm:$0xff]  ;;  %v559_v3 = vld [vmem:[%s2266_s14] sm:$0xff] }
  0x5c   : > { %643 = vmatpush.msra.mxu0 %v579_v46  ;;  %672 = vmatpush.msra.mxu1 %v580_v47  ;;  %v560_v4 = vld [vmem:[%s2266_s14 + $0x8] sm:$0xff]  ;;  %v2397_v5 = vld [vmem:[%s2272_s21 + $0x1d0] sm:$0xff]  ;;  %v2400_v6 = vld [vmem:[%s2272_s21 + $0x1d8] sm:$0xff]  ;;  %s843_s14 = scalar_lea.vmem [#allocation2], %s1847_s4 }
  0x5d   : > { %702 = vmatpush.msra.mxu2 %v577_v44  ;;  %731 = vmatpush.msra.mxu3 %v578_v45  ;;  %v2405_v7 = vld [vmem:[%s2272_s21 + $0x1b0] sm:$0xff]  ;;  %v2408_v8 = vld [vmem:[%s2272_s21 + $0x1b8] sm:$0xff]  ;;  %v2413_v9 = vld [vmem:[%s2272_s21 + $0x1e0] sm:$0xff] }
  0x5e   : > { %644 = vmatpush.msra.mxu0 %v575_v50  ;;  %673 = vmatpush.msra.mxu1 %v576_v51  ;;  %v2416_v10 = vld [vmem:[%s2272_s21 + $0x1e8] sm:$0xff]  ;;  %v556_v11 = vld [vmem:[%s2313_s27 + $0x8] sm:$0xff]  ;;  %v2422_v12 = vld [vmem:[%s2272_s21 + $0x190] sm:$0xff] }
  0x5f   : > { %703 = vmatpush.msra.mxu2 %v573_v48  ;;  %732 = vmatpush.msra.mxu3 %v574_v49  ;;  %v2425_v13 = vld [vmem:[%s2272_s21 + $0x198] sm:$0xff]  ;;  %v2430_v14 = vld [vmem:[%s2272_s21 + $0x1c0] sm:$0xff]  ;;  %v2433_v15 = vld [vmem:[%s2272_s21 + $0x1c8] sm:$0xff] }
  0x60   : > { %645 = vmatpush.msra.mxu0 %v571_v54  ;;  %674 = vmatpush.msra.mxu1 %v572_v55  ;;  %v2436_v16 = vld [vmem:[%s2272_s21 + $0x170] sm:$0xff]  ;;  %v2439_v17 = vld [vmem:[%s2272_s21 + $0x178] sm:$0xff]  ;;  %v2444_v18 = vld [vmem:[%s2272_s21 + $0x1a0] sm:$0xff] }
  0x61   : > { %704 = vmatpush.msra.mxu2 %v569_v52  ;;  %733 = vmatpush.msra.mxu3 %v570_v53  ;;  %v2447_v19 = vld [vmem:[%s2272_s21 + $0x1a8] sm:$0xff]  ;;  %v2452_v20 = vld [vmem:[%s2272_s21 + $0x150] sm:$0xff]  ;;  %v2455_v21 = vld [vmem:[%s2272_s21 + $0x158] sm:$0xff] }
  0x62   : > { %646 = vmatpush.msra.mxu0 %v567_v58  ;;  %675 = vmatpush.msra.mxu1 %v568_v59  ;;  %v2462_v22 = vld [vmem:[%s2272_s21 + $0x180] sm:$0xff]  ;;  %v2465_v23 = vld [vmem:[%s2272_s21 + $0x188] sm:$0xff]  ;;  %v2470_v24 = vld [vmem:[%s2272_s21 + $0x130] sm:$0xff] }
  0x63   : > { %705 = vmatpush.msra.mxu2 %v565_v56  ;;  %734 = vmatpush.msra.mxu3 %v566_v57  ;;  %v2473_v25 = vld [vmem:[%s2272_s21 + $0x138] sm:$0xff]  ;;  %v557_v26 = vld [vmem:[%s2313_s27 + $0x10] sm:$0xff]  ;;  %v2482_v28 = vld [vmem:[%s2272_s21 + $0x168] sm:$0xff] }
  0x64   : > { %647 = vmatpush.msra.mxu0 %v563_v63  ;;  %676 = vmatpush.msra.mxu1 %v564_v0  ;;  %v2479_v27 = vld [vmem:[%s2272_s21 + $0x160] sm:$0xff]  ;;  %v2487_v29 = vld [vmem:[%s2272_s21 + $0x110] sm:$0xff]  ;;  %v2490_v30 = vld [vmem:[%s2272_s21 + $0x118] sm:$0xff] }
  0x65   : > { %706 = vmatpush.msra.mxu2 %v561_v60  ;;  %735 = vmatpush.msra.mxu3 %v562_v61  ;;  %v2493_v31 = vld [vmem:[%s2272_s21 + $0x140] sm:$0xff]  ;;  %v2496_v32 = vld [vmem:[%s2272_s21 + $0x148] sm:$0xff]  ;;  %v2501_v33 = vld [vmem:[%s2272_s21 + $0xf0] sm:$0xff] }
  0x66   : > { %707 = vmatmul.f32.vlgmr.msra.gmra.mxu2 %v555_v62  ;;  %736 = vmatmul.f32.vlgmr.msra.gmra.mxu3 %v555_v62  ;;  %v2504_v34 = vld [vmem:[%s2272_s21 + $0xf8] sm:$0xff]  ;;  %v2509_v35 = vld [vmem:[%s2272_s21 + $0x120] sm:$0xff]  ;;  %v2512_v36 = vld [vmem:[%s2272_s21 + $0x128] sm:$0xff] }
  0x67   : > { %888 = vmatpush.msrb.mxu2 %v2389_v1  ;;  %908 = vmatpush.msrb.mxu3 %v2392_v2  ;;  %v2517_v37 = vld [vmem:[%s2272_s21 + $0xd0] sm:$0xff]  ;;  %v2520_v38 = vld [vmem:[%s2272_s21 + $0xd8] sm:$0xff]  ;;  %v2527_v39 = vld [vmem:[%s2272_s21 + $0x100] sm:$0xff] }
  0x68   : > { %648 = vmatpush.msra.mxu0 %v559_v3  ;;  %677 = vmatpush.msra.mxu1 %v560_v4  ;;  %3053 = vst [vmem:[#allocation21_spill] sm:$0xff] %v2520_v38  ;;  %v2530_v40 = vld [vmem:[%s2272_s21 + $0x108] sm:$0xff]  ;;  %v2535_v41 = vld [vmem:[%s2272_s21 + $0xb0] sm:$0xff]  ;;  %v2538_v42 = vld [vmem:[%s2272_s21 + $0xb8] sm:$0xff] }
  0x69   : > { %889 = vmatpush.msrb.mxu2 %v2397_v5  ;;  %909 = vmatpush.msrb.mxu3 %v2400_v6  ;;  %3054 = vst [vmem:[#allocation22_spill] sm:$0xff] %v2535_v41  ;;  %v558_v43 = vld [vmem:[%s2313_s27 + $0x18] sm:$0xff]  ;;  %v2544_v44 = vld [vmem:[%s2272_s21 + $0xe0] sm:$0xff]  ;;  %v2552_v46 = vld [vmem:[%s2272_s21 + $0x90] sm:$0xff] }
  0x6a   : > { %649 = vmatmul.f32.vlgmr.msra.gmra.mxu0 %v555_v62  ;;  %678 = vmatmul.f32.vlgmr.msra.gmra.mxu1 %v555_v62  ;;  %3055 = vst [vmem:[#allocation23_spill] sm:$0xff] %v2538_v42  ;;  %v2547_v45 = vld [vmem:[%s2272_s21 + $0xe8] sm:$0xff]  ;;  %v2555_v47 = vld [vmem:[%s2272_s21 + $0x98] sm:$0xff]  ;;  %v2558_v48 = vld [vmem:[%s2272_s21 + $0xc0] sm:$0xff] }
  0x6b   : > { %890 = vmatpush.msrb.mxu2 %v2405_v7  ;;  %910 = vmatpush.msrb.mxu3 %v2408_v8  ;;  %3056 = vst [vmem:[#allocation24_spill] sm:$0xff] %v2552_v46  ;;  %v2561_v49 = vld [vmem:[%s2272_s21 + $0xc8] sm:$0xff]  ;;  %v2566_v50 = vld [vmem:[%s2272_s21 + $0x70] sm:$0xff]  ;;  %v2569_v51 = vld [vmem:[%s2272_s21 + $0x78] sm:$0xff] }
  0x6c   : > { %848 = vmatpush.msrb.mxu0 %v2413_v9  ;;  %868 = vmatpush.msrb.mxu1 %v2416_v10  ;;  %3057 = vst [vmem:[#allocation25_spill] sm:$0xff] %v2555_v47  ;;  %v2574_v52 = vld [vmem:[%s2272_s21 + $0xa0] sm:$0xff]  ;;  %v2577_v53 = vld [vmem:[%s2272_s21 + $0xa8] sm:$0xff]  ;;  %v2582_v54 = vld [vmem:[%s2272_s21 + $0x50] sm:$0xff] }
  0x6d   : > { %891 = vmatpush.msrb.mxu2 %v2422_v12  ;;  %911 = vmatpush.msrb.mxu3 %v2425_v13  ;;  %3058 = vst [vmem:[#allocation26_spill] sm:$0xff] %v2566_v50  ;;  %v2585_v55 = vld [vmem:[%s2272_s21 + $0x58] sm:$0xff]  ;;  %v2592_v56 = vld [vmem:[%s2272_s21 + $0x80] sm:$0xff]  ;;  %v2595_v57 = vld [vmem:[%s2272_s21 + $0x88] sm:$0xff] }
  0x6e   : > { %710 = vmatmul.f32.gmra.mxu2 %v556_v11  ;;  %739 = vmatmul.f32.gmra.mxu3 %v556_v11  ;;  %3059 = vst [vmem:[#allocation27_spill] sm:$0xff] %v2569_v51  ;;  %v2600_v58 = vld [vmem:[%s2272_s21 + $0x30] sm:$0xff]  ;;  %v2603_v59 = vld [vmem:[%s2272_s21 + $0x38] sm:$0xff]  ;;  %v2606_v60 = vld [vmem:[%s2272_s21 + $0x60] sm:$0xff] }
  0x6f   : > { %849 = vmatpush.msrb.mxu0 %v2430_v14  ;;  %869 = vmatpush.msrb.mxu1 %v2433_v15  ;;  %3060 = vst [vmem:[#allocation28_spill] sm:$0xff] %v2574_v52  ;;  %v2609_v61 = vld [vmem:[%s2272_s21 + $0x68] sm:$0xff]  ;;  %v2614_v62 = vld [vmem:[%s2272_s21 + $0x10] sm:$0xff]  ;;  %v2617_v63 = vld [vmem:[%s2272_s21 + $0x18] sm:$0xff] }
  0x70   : > { %892 = vmatpush.msrb.mxu2 %v2436_v16  ;;  %912 = vmatpush.msrb.mxu3 %v2439_v17  ;;  %3061 = vst [vmem:[#allocation29_spill] sm:$0xff] %v2577_v53  ;;  %v2622_v0 = vld [vmem:[%s2272_s21 + $0x40] sm:$0xff]  ;;  %v2625_v3 = vld [vmem:[%s2272_s21 + $0x48] sm:$0xff]  ;;  %v2629_v4 = vld [vmem:[#allocation3] sm:$0xff] }
  0x71   : > { %850 = vmatpush.msrb.mxu0 %v2444_v18  ;;  %870 = vmatpush.msrb.mxu1 %v2447_v19  ;;  %3062 = vst [vmem:[#allocation30_spill] sm:$0xff] %v2582_v54 }
  0x72   : > { %893 = vmatpush.msrb.mxu2 %v2452_v20  ;;  %913 = vmatpush.msrb.mxu3 %v2455_v21  ;;  %3063 = vst [vmem:[#allocation31_spill] sm:$0xff] %v2585_v55 }
  0x73   : > { %652 = vmatmul.f32.gmra.mxu0 %v556_v11  ;;  %681 = vmatmul.f32.gmra.mxu1 %v556_v11  ;;  %3064 = vst [vmem:[#allocation32_spill] sm:$0xff] %v2592_v56  ;;  %v2634_v11 = vld [vmem:[%s2272_s21 + $0x20] sm:$0xff] }
  0x74   : > { %851 = vmatpush.msrb.mxu0 %v2462_v22  ;;  %871 = vmatpush.msrb.mxu1 %v2465_v23  ;;  %3065 = vst [vmem:[#allocation33_spill] sm:$0xff] %v2595_v57 }
  0x75   : > { %894 = vmatpush.msrb.mxu2 %v2470_v24  ;;  %914 = vmatpush.msrb.mxu3 %v2473_v25  ;;  %3066 = vst [vmem:[#allocation34_spill] sm:$0xff] %v2600_v58 }
  0x76   : > { %713 = vmatmul.f32.gmra.mxu2 %v557_v26  ;;  %742 = vmatmul.f32.gmra.mxu3 %v557_v26  ;;  %3067 = vst [vmem:[#allocation35_spill] sm:$0xff] %v2603_v59 }
  0x77   : > { %852 = vmatpush.msrb.mxu0 %v2479_v27  ;;  %872 = vmatpush.msrb.mxu1 %v2482_v28  ;;  %3068 = vst [vmem:[#allocation36_spill] sm:$0xff] %v2606_v60 }
  0x78   : > { %895 = vmatpush.msrb.mxu2 %v2487_v29  ;;  %915 = vmatpush.msrb.mxu3 %v2490_v30  ;;  %3069 = vst [vmem:[#allocation37_spill] sm:$0xff] %v2609_v61 }
  0x79   : > { %853 = vmatpush.msrb.mxu0 %v2493_v31  ;;  %873 = vmatpush.msrb.mxu1 %v2496_v32  ;;  %3070 = vst [vmem:[#allocation38_spill] sm:$0xff] %v2614_v62 }
  0x7a   : > { %896 = vmatpush.msrb.mxu2 %v2501_v33  ;;  %916 = vmatpush.msrb.mxu3 %v2504_v34  ;;  %3071 = vst [vmem:[#allocation39_spill] sm:$0xff] %v2617_v63 }
  0x7b   : > { %854 = vmatpush.msrb.mxu0 %v2509_v35  ;;  %874 = vmatpush.msrb.mxu1 %v2512_v36  ;;  %3072 = vst [vmem:[#allocation40_spill] sm:$0xff] %v2622_v0 }
  0x7c   : > { %897 = vmatpush.msrb.mxu2 %v2517_v37  ;;  %917 = vmatpush.msrb.mxu3 %v2520_v38  ;;  %3073 = vst [vmem:[#allocation41_spill] sm:$0xff] %v2625_v3 }
  0x7d   : > { %655 = vmatmul.f32.gmra.mxu0 %v557_v26  ;;  %684 = vmatmul.f32.gmra.mxu1 %v557_v26  ;;  %3074 = vst [vmem:[#allocation42_spill] sm:$0xff] %v2629_v4  ;;  %v2637_v26 = vld [vmem:[%s2272_s21 + $0x28] sm:$0xff] }
  0x7e   : > { %855 = vmatpush.msrb.mxu0 %v2527_v39  ;;  %875 = vmatpush.msrb.mxu1 %v2530_v40  ;;  %3075 = vst [vmem:[#allocation43_spill] sm:$0xff] %v2634_v11 }
  0x7f   : > { %898 = vmatpush.msrb.mxu2 %v2535_v41  ;;  %918 = vmatpush.msrb.mxu3 %v2538_v42  ;;  %3076 = vst [vmem:[#allocation44_spill] sm:$0xff] %v2637_v26 }
  0x80   : > { %716 = vmatmul.f32.gmra.mxu2 %v558_v43  ;;  %745 = vmatmul.f32.gmra.mxu3 %v558_v43 }
  0x81   : > { %856 = vmatpush.msrb.mxu0 %v2544_v44  ;;  %876 = vmatpush.msrb.mxu1 %v2547_v45 }
  0x82   : > { %899 = vmatpush.msrb.mxu2 %v2552_v46  ;;  %919 = vmatpush.msrb.mxu3 %v2555_v47 }
  0x83   : > { %857 = vmatpush.msrb.mxu0 %v2558_v48  ;;  %877 = vmatpush.msrb.mxu1 %v2561_v49 }
  0x84   : > { %900 = vmatpush.msrb.mxu2 %v2566_v50  ;;  %920 = vmatpush.msrb.mxu3 %v2569_v51 }
  0x85   : > { %858 = vmatpush.msrb.mxu0 %v2574_v52  ;;  %878 = vmatpush.msrb.mxu1 %v2577_v53 }
  0x86   : > { %901 = vmatpush.msrb.mxu2 %v2582_v54  ;;  %921 = vmatpush.msrb.mxu3 %v2585_v55 }
  0x87   : > { %658 = vmatmul.f32.gmra.mxu0 %v558_v43  ;;  %687 = vmatmul.f32.gmra.mxu1 %v558_v43  ;;  %v2644_v43 = vld [vmem:[%s2272_s21] sm:$0xff] }
  0x88   : > { %859 = vmatpush.msrb.mxu0 %v2592_v56  ;;  %879 = vmatpush.msrb.mxu1 %v2595_v57  ;;  %3077 = vst [vmem:[#allocation45_spill] sm:$0xff] %v2644_v43 }
  0x89   : > { %902 = vmatpush.msrb.mxu2 %v2600_v58  ;;  %922 = vmatpush.msrb.mxu3 %v2603_v59  ;;  %v2647_v59 = vld [vmem:[%s2272_s21 + $0x8] sm:$0xff]  ;;  %s3080_s21 = sld [smem:[#allocation20_spill]] }
  0x8a   : > { %860 = vmatpush.msrb.mxu0 %v2606_v60  ;;  %880 = vmatpush.msrb.mxu1 %v2609_v61  ;;  %3078 = vst [vmem:[#allocation46_spill] sm:$0xff] %v2647_v59 }
  0x8b   : > { %903 = vmatpush.msrb.mxu2 %v2614_v62  ;;  %923 = vmatpush.msrb.mxu3 %v2617_v63 }
  0x8c   : > { %861 = vmatpush.msrb.mxu0 %v2622_v0  ;;  %881 = vmatpush.msrb.mxu1 %v2625_v3 }
  0x8d   : > { %904 = vmatmul.f32.vlgmr.msrb.gmra.mxu2 %v2629_v4  ;;  %924 = vmatmul.f32.vlgmr.msrb.gmra.mxu3 %v2629_v4 }
  0x8e   : > { %862 = vmatpush.msrb.mxu0 %v2634_v11  ;;  %882 = vmatpush.msrb.mxu1 %v2637_v26 }
  0x8f   : > { %1060 = vmatpush.msra.mxu2 %v2389_v1  ;;  %1080 = vmatpush.msra.mxu3 %v2392_v2  ;;  %s995_s16 = sadd.s32 %s3080_s21, %s837_s10 }
  0x90   : > { %863 = vmatpush.msrb.mxu0 %v2644_v43  ;;  %883 = vmatpush.msrb.mxu1 %v2647_v59  ;;  %p996_p3 = scmp.lt.s32.totalorder %s995_s16, 10 }
  0x91   : > { %864 = vmatmul.f32.vlgmr.msrb.gmra.mxu0 %v2629_v4  ;;  %884 = vmatmul.f32.vlgmr.msrb.gmra.mxu1 %v2629_v4  ;;  %v3079_v4 = vld [vmem:[#allocation35_spill] sm:$0xff] }
  0x92   : > { %1020 = vmatpush.msra.mxu0 %v2413_v9  ;;  %1040 = vmatpush.msra.mxu1 %v2416_v10  ;;  %s997_s25 = scalar_select %p996_p3, 1, 0 }
  0x93   : > { %1061 = vmatpush.msra.mxu2 %v2397_v5  ;;  %1081 = vmatpush.msra.mxu3 %v2400_v6 }
  0x94   : > { %1021 = vmatpush.msra.mxu0 %v2430_v14  ;;  %1041 = vmatpush.msra.mxu1 %v2433_v15  ;;  %s998_s13 = scvt.s32.f32 %s997_s25 }
  0x95   : > { %1062 = vmatpush.msra.mxu2 %v2405_v7  ;;  %1082 = vmatpush.msra.mxu3 %v2408_v8 }
  0x96   : > { %1022 = vmatpush.msra.mxu0 %v2444_v18  ;;  %1042 = vmatpush.msra.mxu1 %v2447_v19 }
  0x97   : > { %1063 = vmatpush.msra.mxu2 %v2422_v12  ;;  %1083 = vmatpush.msra.mxu3 %v2425_v13 }
  0x98   : > { %1023 = vmatpush.msra.mxu0 %v2462_v22  ;;  %1043 = vmatpush.msra.mxu1 %v2465_v23 }
  0x99   : > { %1064 = vmatpush.msra.mxu2 %v2436_v16  ;;  %1084 = vmatpush.msra.mxu3 %v2439_v17 }
  0x9a   : > { %1024 = vmatpush.msra.mxu0 %v2479_v27  ;;  %1044 = vmatpush.msra.mxu1 %v2482_v28 }
  0x9b   : > { %1065 = vmatpush.msra.mxu2 %v2452_v20  ;;  %1085 = vmatpush.msra.mxu3 %v2455_v21 }
  0x9c   : > { %1025 = vmatpush.msra.mxu0 %v2493_v31  ;;  %1045 = vmatpush.msra.mxu1 %v2496_v32 }
  0x9d   : > { %1066 = vmatpush.msra.mxu2 %v2470_v24  ;;  %1086 = vmatpush.msra.mxu3 %v2473_v25 }
  0x9e   : > { %1026 = vmatpush.msra.mxu0 %v2509_v35  ;;  %1046 = vmatpush.msra.mxu1 %v2512_v36 }
  0x9f   : > { %1067 = vmatpush.msra.mxu2 %v2487_v29  ;;  %1087 = vmatpush.msra.mxu3 %v2490_v30 }
  0xa0   : > { %1027 = vmatpush.msra.mxu0 %v2527_v39  ;;  %1047 = vmatpush.msra.mxu1 %v2530_v40 }
  0xa1   : > { %1068 = vmatpush.msra.mxu2 %v2501_v33  ;;  %1088 = vmatpush.msra.mxu3 %v2504_v34 }
  0xa2   : > { %1028 = vmatpush.msra.mxu0 %v2544_v44  ;;  %1048 = vmatpush.msra.mxu1 %v2547_v45 }
  0xa3   : > { %1069 = vmatpush.msra.mxu2 %v2517_v37  ;;  %1089 = vmatpush.msra.mxu3 %v2520_v38 }
  0xa4   : > { %1029 = vmatpush.msra.mxu0 %v2558_v48  ;;  %1049 = vmatpush.msra.mxu1 %v2561_v49 }
  0xa5   : > { %1070 = vmatpush.msra.mxu2 %v2535_v41  ;;  %1090 = vmatpush.msra.mxu3 %v2538_v42 }
  0xa6   : > { %1030 = vmatpush.msra.mxu0 %v2574_v52  ;;  %1050 = vmatpush.msra.mxu1 %v2577_v53 }
  0xa7   : > { %1071 = vmatpush.msra.mxu2 %v2552_v46  ;;  %1091 = vmatpush.msra.mxu3 %v2555_v47 }
  0xa8   : > { %1031 = vmatpush.msra.mxu0 %v2592_v56  ;;  %1051 = vmatpush.msra.mxu1 %v2595_v57 }
  0xa9   : > { %1072 = vmatpush.msra.mxu2 %v2566_v50  ;;  %1092 = vmatpush.msra.mxu3 %v2569_v51 }
  0xaa   : > { %1032 = vmatpush.msra.mxu0 %v2606_v60  ;;  %1052 = vmatpush.msra.mxu1 %v2609_v61 }
  0xab   : > { %1073 = vmatpush.msra.mxu2 %v2582_v54  ;;  %1093 = vmatpush.msra.mxu3 %v2585_v55 }
  0xac   : > { %1033 = vmatpush.msra.mxu0 %v2622_v0  ;;  %1053 = vmatpush.msra.mxu1 %v2625_v3 }
  0xad   : > { %1074 = vmatpush.msra.mxu2 %v2600_v58  ;;  %1094 = vmatpush.msra.mxu3 %v3079_v4 }
  0xae   : > { %1034 = vmatpush.msra.mxu0 %v2634_v11  ;;  %1054 = vmatpush.msra.mxu1 %v2637_v26 }
  0xaf   : > { %1075 = vmatpush.msra.mxu2 %v2614_v62  ;;  %1095 = vmatpush.msra.mxu3 %v2617_v63 }
  0xb0   : > { %1035 = vmatpush.msra.mxu0 %v2644_v43  ;;  %1055 = vmatpush.msra.mxu1 %v2647_v59 }
  0xb1   : > { %1232 = vmatpush.msrb.mxu2 %v2389_v1  ;;  %1252 = vmatpush.msrb.mxu3 %v2392_v2 }
  0xb2   : > { %1192 = vmatpush.msrb.mxu0 %v2413_v9  ;;  %1212 = vmatpush.msrb.mxu1 %v2416_v10 }
  0xb3   : > { %1233 = vmatpush.msrb.mxu2 %v2397_v5  ;;  %1253 = vmatpush.msrb.mxu3 %v2400_v6 }
  0xb4   : > { %1193 = vmatpush.msrb.mxu0 %v2430_v14  ;;  %1213 = vmatpush.msrb.mxu1 %v2433_v15 }
  0xb5   : > { %1234 = vmatpush.msrb.mxu2 %v2405_v7  ;;  %1254 = vmatpush.msrb.mxu3 %v2408_v8 }
  0xb6   : > { %1194 = vmatpush.msrb.mxu0 %v2444_v18  ;;  %1214 = vmatpush.msrb.mxu1 %v2447_v19 }
  0xb7   : > { %1235 = vmatpush.msrb.mxu2 %v2422_v12  ;;  %1255 = vmatpush.msrb.mxu3 %v2425_v13 }
  0xb8   : > { %1195 = vmatpush.msrb.mxu0 %v2462_v22  ;;  %1215 = vmatpush.msrb.mxu1 %v2465_v23 }
  0xb9   : > { %1236 = vmatpush.msrb.mxu2 %v2436_v16  ;;  %1256 = vmatpush.msrb.mxu3 %v2439_v17 }
  0xba   : > { %1196 = vmatpush.msrb.mxu0 %v2479_v27  ;;  %1216 = vmatpush.msrb.mxu1 %v2482_v28 }
  0xbb   : > { %1237 = vmatpush.msrb.mxu2 %v2452_v20  ;;  %1257 = vmatpush.msrb.mxu3 %v2455_v21 }
  0xbc   : > { %1197 = vmatpush.msrb.mxu0 %v2493_v31  ;;  %1217 = vmatpush.msrb.mxu1 %v2496_v32 }
  0xbd   : > { %1238 = vmatpush.msrb.mxu2 %v2470_v24  ;;  %1258 = vmatpush.msrb.mxu3 %v2473_v25 }
  0xbe   : > { %1198 = vmatpush.msrb.mxu0 %v2509_v35  ;;  %1218 = vmatpush.msrb.mxu1 %v2512_v36 }
  0xbf   : > { %1239 = vmatpush.msrb.mxu2 %v2487_v29  ;;  %1259 = vmatpush.msrb.mxu3 %v2490_v30 }
  0xc0   : > { %1199 = vmatpush.msrb.mxu0 %v2527_v39  ;;  %1219 = vmatpush.msrb.mxu1 %v2530_v40 }
  0xc1   : > { %1240 = vmatpush.msrb.mxu2 %v2501_v33  ;;  %1260 = vmatpush.msrb.mxu3 %v2504_v34 }
  0xc2   : > { %1200 = vmatpush.msrb.mxu0 %v2544_v44  ;;  %1220 = vmatpush.msrb.mxu1 %v2547_v45 }
  0xc3   : > { %1241 = vmatpush.msrb.mxu2 %v2517_v37  ;;  %1261 = vmatpush.msrb.mxu3 %v2520_v38 }
  0xc4   : > { %1201 = vmatpush.msrb.mxu0 %v2558_v48  ;;  %1221 = vmatpush.msrb.mxu1 %v2561_v49 }
  0xc5   : > { %1242 = vmatpush.msrb.mxu2 %v2535_v41  ;;  %1262 = vmatpush.msrb.mxu3 %v2538_v42  ;;  %v2790_v41 = vld [vmem:[#allocation4] sm:$0xff] }
  0xc6   : > { %1202 = vmatpush.msrb.mxu0 %v2574_v52  ;;  %1222 = vmatpush.msrb.mxu1 %v2577_v53 }
  0xc7   : > { %1243 = vmatpush.msrb.mxu2 %v2552_v46  ;;  %1263 = vmatpush.msrb.mxu3 %v2555_v47 }
  0xc8   : > { %1203 = vmatpush.msrb.mxu0 %v2592_v56  ;;  %1223 = vmatpush.msrb.mxu1 %v2595_v57 }
  0xc9   : > { %1244 = vmatpush.msrb.mxu2 %v2566_v50  ;;  %1264 = vmatpush.msrb.mxu3 %v2569_v51 }
  0xca   : > { %1204 = vmatpush.msrb.mxu0 %v2606_v60  ;;  %1224 = vmatpush.msrb.mxu1 %v2609_v61 }
  0xcb   : > { %1245 = vmatpush.msrb.mxu2 %v2582_v54  ;;  %1265 = vmatpush.msrb.mxu3 %v2585_v55 }
  0xcc   : > { %1205 = vmatpush.msrb.mxu0 %v2622_v0  ;;  %1225 = vmatpush.msrb.mxu1 %v2625_v3  ;;  %v623_v3 = vld [vmem:[%s2304_s11] sm:$0xf]  ;;  %s3094_s11 = sld [smem:[#allocation19_spill]] }
  0xcd   : > { %1246 = vmatpush.msrb.mxu2 %v2600_v58  ;;  %1266 = vmatpush.msrb.mxu3 %v3079_v4  ;;  %v625_v54 = vperm.slane %v623_v3, 0  ;;  %v626_v0 = vperm.slane %v623_v3, 1  ;;  %v627_v55 = vperm.slane %v623_v3, 2  ;;  %v628_v51 = vperm.slane %v623_v3, 3 }
  0xce   : > { %1206 = vmatpush.msrb.mxu0 %v2634_v11  ;;  %1226 = vmatpush.msrb.mxu1 %v2637_v26 }
  0xcf   : > { %1247 = vmatpush.msrb.mxu2 %v2614_v62  ;;  %1267 = vmatpush.msrb.mxu3 %v2617_v63 }
  0xd0   : > { %1207 = vmatpush.msrb.mxu0 %v2644_v43  ;;  %1227 = vmatpush.msrb.mxu1 %v2647_v59 }
  0xd2   : > { %s2874_s15 = sadd.s32 %s1823_s12, %s3094_s11  ;;  %s1830_s4 = sshll.u32 %s3094_s11, 1 }
  0xd3   : > { %s1824_s20 = sshll.u32 %s2874_s15, 3  ;;  %s1167_s24 = sadd.s32 %s3080_s21, %s2874_s15 }
  0xd4   : > { %s1011_s23 = sshra.s32 %s1824_s20, 3  ;;  %p2881_p4 = scmp.lt.s32.totalorder %s1167_s24, 10 }
  0xd5   : > { %s1848_s27 = sshll.u32 %s1011_s23, 5  ;;  %s1178_s2 = scalar_lea.vmem %s2322_s29, %s1824_s20 }
  0xd6   : > { %s1015_s19 = scalar_lea.vmem [#allocation2], %s1848_s27  ;;  %s1353_s23 = smul.u32 24, %s3094_s11 }
  0xd7   : > { %s1169_s26 = scalar_select %p2881_p4, 1, 0 }
  0xd8   : > { %s1354_s27 = sshra.s32 %s1353_s23, 3  ;;  %s1352_s17 = smul.u32 3, %s3094_s11 }
  0xd9   : > { %s1170_s1 = scvt.s32.f32 %s1169_s26 }
  0xda   : > { %s1510_s26 = sadd.s32 %s3080_s21, %s1352_s17 }
  0xdb   : > { %p1511_p6 = scmp.lt.s32.totalorder %s1510_s26, 10 }
  0xe7   : > { %v650_v11 = vpop.f32.mrf.mxu0  ;;  %v679_v50 = vpop.f32.mrf.mxu1 }
  0xe8   : > { %v651_v26 = vadd.f32 %v650_v11, %v625_v54  ;;  %v680_v61 = vadd.f32 %v679_v50, %v626_v0 }
  0xe9   : > { %v708_v58 = vpop.f32.mrf.mxu2  ;;  %v737_v60 = vpop.f32.mrf.mxu3 }
  0xea   : > { %v709_v4 = vadd.f32 %v708_v58, %v627_v55  ;;  %v738_v47 = vadd.f32 %v737_v60, %v628_v51  ;;  %749 = vst [vmem:[#allocation2] sm:$0xff] %v651_v26 }
  0xeb   : > { %750 = vst [vmem:[#allocation2 + $0x8] sm:$0xff] %v680_v61 }
  0xec   : > { %751 = vst [vmem:[#allocation2 + $0x10] sm:$0xff] %v709_v4 }
  0xed   : > { %752 = vst [vmem:[#allocation2 + $0x18] sm:$0xff] %v738_v47 }
  0xf0   : > { %v653_v62 = vpop.f32.mrf.mxu0  ;;  %v682_v59 = vpop.f32.mrf.mxu1 }
  0xf1   : > { %v654_v63 = vadd.f32 %v653_v62, %v625_v54  ;;  %v683_v43 = vadd.f32 %v682_v59, %v626_v0  ;;  %v711_v46 = vpop.f32.mrf.mxu2  ;;  %v740_v57 = vpop.f32.mrf.mxu3 }
  0xf2   : > { %v712_v56 = vadd.f32 %v711_v46, %v627_v55  ;;  %v741_v3 = vadd.f32 %v740_v57, %v628_v51 }
  0xf3   : > { %753 = vst [vmem:[#allocation2 + $0x20] sm:$0xff] %v654_v63 }
  0xf4   : > { %754 = vst [vmem:[#allocation2 + $0x28] sm:$0xff] %v683_v43 }
  0xf5   : > { %755 = vst [vmem:[#allocation2 + $0x30] sm:$0xff] %v712_v56 }
  0xf6   : > { %756 = vst [vmem:[#allocation2 + $0x38] sm:$0xff] %v741_v3 }
  0xf9   : > { %v714_v50 = vpop.f32.mrf.mxu2  ;;  %v743_v58 = vpop.f32.mrf.mxu3 }
  0xfa   : > { %v656_v60 = vpop.f32.mrf.mxu0  ;;  %v685_v11 = vpop.f32.mrf.mxu1  ;;  %v715_v61 = vadd.f32 %v714_v50, %v627_v55  ;;  %v744_v26 = vadd.f32 %v743_v58, %v628_v51 }
  0xfb   : > { %v657_v4 = vadd.f32 %v656_v60, %v625_v54  ;;  %v686_v47 = vadd.f32 %v685_v11, %v626_v0 }
  0xfc   : > { %759 = vst [vmem:[#allocation2 + $0x50] sm:$0xff] %v715_v61 }
  0xfd   : > { %757 = vst [vmem:[#allocation2 + $0x40] sm:$0xff] %v657_v4 }
  0xfe   : > { %758 = vst [vmem:[#allocation2 + $0x48] sm:$0xff] %v686_v47 }
  0xff   : > { %760 = vst [vmem:[#allocation2 + $0x58] sm:$0xff] %v744_v26 }
 0x103   : > { %v717_v46 = vpop.f32.mrf.mxu2  ;;  %v746_v57 = vpop.f32.mrf.mxu3 }
 0x104   : > { %v659_v59 = vpop.f32.mrf.mxu0  ;;  %v688_v56 = vpop.f32.mrf.mxu1  ;;  %v718_v62 = vadd.f32 %v717_v46, %v627_v55  ;;  %v747_v3 = vadd.f32 %v746_v57, %v628_v51 }
 0x105   : > { %v660_v63 = vadd.f32 %v659_v59, %v625_v54  ;;  %v689_v43 = vadd.f32 %v688_v56, %v626_v0 }
 0x106   : > { %763 = vst [vmem:[#allocation2 + $0x70] sm:$0xff] %v718_v62 }
 0x107   : > { %761 = vst [vmem:[#allocation2 + $0x60] sm:$0xff] %v660_v63 }
 0x108   : > { %762 = vst [vmem:[#allocation2 + $0x68] sm:$0xff] %v689_v43 }
 0x109   : > { %764 = vst [vmem:[#allocation2 + $0x78] sm:$0xff] %v747_v3 }
 0x10e   : > { %v865_v50 = vpop.f32.mrf.mxu0  ;;  %v885_v58 = vpop.f32.mrf.mxu1 }
 0x110   : > { %v844_v60 = vld [vmem:[%s843_s14] sm:$0xff]  ;;  %v845_v11 = vld [vmem:[%s843_s14 + $0x8] sm:$0xff]  ;;  %v846_v61 = vld [vmem:[%s843_s14 + $0x10] sm:$0xff]  ;;  %v905_v4 = vpop.f32.mrf.mxu2  ;;  %v925_v3 = vpop.f32.mrf.mxu3 }
 0x111   : > { %v928_v47 = vadd.f32 %v865_v50, %v844_v60  ;;  %v929_v26 = vadd.f32 %v885_v58, %v845_v11  ;;  %v930_v55 = vadd.f32 %v905_v4, %v846_v61  ;;  %v847_v43 = vld [vmem:[%s843_s14 + $0x18] sm:$0xff]  ;;  %s2905_s14 = sadd.s32 %s2112_s9, %s1830_s4 }
 0x112   : > { %v931_v58 = vadd.f32 %v925_v3, %v847_v43  ;;  %s1831_s10 = sshll.u32 %s2905_s14, 3  ;;  %s1339_s9 = sadd.s32 %s3080_s21, %s2905_s14 }
 0x113   : > { %v1820_v54 = vmul.f32 -1.442695, %v928_v47  ;;  %v1821_v51 = vmul.f32 -1.442695, %v929_v26  ;;  %v1822_v0 = vmul.f32 -1.442695, %v930_v55  ;;  %s1350_s20 = scalar_lea.vmem %s2322_s29, %s1831_s10 }
 0x114   : > { %s1183_s16 = sshra.s32 %s1831_s10, 3  ;;  %p2912_p5 = scmp.lt.s32.totalorder %s1339_s9, 10 }
 0x115   : > { %1930 = vpow2.f32 %v1820_v54  ;;  %s1849_s25 = sshll.u32 %s1183_s16, 5 }
 0x116   : > { %1932 = vpow2.f32 %v1821_v51  ;;  %s1341_s12 = scalar_select %p2912_p5, 1, 0 }
 0x117   : > { %1934 = vpow2.f32 %v1822_v0  ;;  %s1512_s21 = scalar_select %p1511_p6, 1, 0 }
 0x118   : > { %s1342_s15 = scvt.s32.f32 %s1341_s12 }
 0x11b   : > { %v1931_v46 = vpop.eup %1930 }
 0x11c   : > { %v1933_v57 = vpop.eup %1932  ;;  %v941_v59 = vadd.f32 1.0, %v1931_v46 }
 0x11d   : > { %v1935_v56 = vpop.eup %1934  ;;  %v942_v62 = vadd.f32 1.0, %v1933_v57 }
 0x11e   : > { %1936 = vrcp.f32 %v941_v59  ;;  %v943_v63 = vadd.f32 1.0, %v1935_v56  ;;  %v955_v54 = vand.u32 2147483648, %v941_v59  ;;  %v953_v46 = vand.u32 2147483647, %v941_v59 }
 0x11f   : > { %1938 = vrcp.f32 %v942_v62  ;;  %v970_v51 = vand.u32 2147483648, %v942_v62  ;;  %v968_v56 = vand.u32 2147483647, %v942_v62  ;;  %vm949_vm2 = vweird.f32 %v941_v59 }
 0x120   : > { %1940 = vrcp.f32 %v943_v63  ;;  %vm964_vm3 = vweird.f32 %v942_v62  ;;  %v956_v3 = vor.u32 1.1754944e-38, %v955_v54  ;;  %vm954_vm6 = vcmp.eq.f32.partialorder %v953_v46, 8.507059e+37 }
 0x121   : > { %1942 = vtanh.f32 %v931_v58  ;;  %vm969_vm7 = vcmp.eq.f32.partialorder %v968_v56, 8.507059e+37  ;;  %v1000_v54 = vstv %s998_s13  ;;  %vm979_vm9 = vweird.f32 %v943_v63  ;;  %s1187_s13 = scalar_lea.vmem [#allocation2], %s1849_s25 }
 0x122   : > { %v983_v46 = vand.u32 2147483647, %v943_v63 }
 0x124   : > { %v1937_v50 = vpop.eup %1936  ;;  %vm984_vm11 = vcmp.eq.f32.partialorder %v983_v46, 8.507059e+37 }
 0x125   : > { %v1939_v60 = vpop.eup %1938  ;;  %v945_v11 = vmul.f32 %v1937_v50, %v941_v59  ;;  %vm950_vm0 = vweird.f32 %v1937_v50 }
 0x126   : > { %v1941_v61 = vpop.eup %1940  ;;  %v960_v4 = vmul.f32 %v1939_v60, %v942_v62  ;;  %vm965_vm1 = vweird.f32 %v1939_v60  ;;  %vm951_vm4 = vmor %vm949_vm2, %vm950_vm0 }
 0x127   : > { %v946_v47 = vsub.f32 1.0, %v945_v11  ;;  %v975_v26 = vmul.f32 %v1941_v61, %v943_v63  ;;  %vm966_vm5 = vmor %vm964_vm3, %vm965_vm1  ;;  %vm980_vm8 = vweird.f32 %v1941_v61 }
 0x128   : > { %v961_v55 = vsub.f32 1.0, %v960_v4  ;;  %v971_v4 = vor.u32 1.1754944e-38, %v970_v51  ;;  %v985_v51 = vand.u32 2147483648, %v943_v63  ;;  %vm981_vm10 = vmor %vm979_vm9, %vm980_vm8 }
 0x129   : > { %v947_v0 = vmul.f32 %v1937_v50, %v946_v47  ;;  %v976_v42 = vsub.f32 1.0, %v975_v26  ;;  %v1943_v47 = vpop.eup %1942 }
 0x12a   : > { %v962_v57 = vmul.f32 %v1939_v60, %v961_v55 }
 0x12b   : > { %v948_v43 = vadd.f32 %v1937_v50, %v947_v0  ;;  %v977_v52 = vmul.f32 %v1941_v61, %v976_v42 }
 0x12c   : > { %v963_v11 = vadd.f32 %v1939_v60, %v962_v57 }
 0x12d   : > { %v952_v58 = vsel %vm951_vm4, %v1937_v50, %v948_v43  ;;  %v978_v38 = vadd.f32 %v1941_v61, %v977_v52  ;;  %v3081_v52 = vld [vmem:[#allocation42_spill] sm:$0xff] }
 0x12e   : > { %v957_v53 = vsel %vm954_vm6, %v956_v3, %v952_v58  ;;  %v967_v55 = vsel %vm966_vm5, %v1939_v60, %v963_v11 }
 0x12f   : > { %v972_v26 = vsel %vm969_vm7, %v971_v4, %v967_v55  ;;  %v991_v0 = vmul.f32 %v1943_v47, %v957_v53  ;;  %v982_v42 = vsel %vm981_vm10, %v1941_v61, %v978_v38  ;;  %v986_v53 = vor.u32 1.1754944e-38, %v985_v51  ;;  %v1018_v38 = vld [vmem:[%s1015_s19 + $0x10] sm:$0xff]  ;;  %v1019_v55 = vld [vmem:[%s1015_s19 + $0x18] sm:$0xff] }
 0x130   : > { %v990_v59 = vmul.f32 %v972_v26, %v2790_v41 }
 0x131   : > { %v987_v56 = vsel %vm984_vm11, %v986_v53, %v982_v42 }
 0x132   : > { %v992_v62 = vadd.f32 %v991_v0, %v990_v59 }
 0x134   : > { %1944 = vtanh.f32 %v992_v62  ;;  %v1003_v50 = vsub.f32 %v992_v62, %v2790_v41 }
 0x136   : > { %v2794_v60 = vmul.f32 %v1003_v50, %v1000_v54 }
 0x13a   : > { %v1945_v57 = vpop.eup %1944 }
 0x13b   : > { %v994_v43 = vmul.f32 %v1945_v57, %v987_v56 }
 0x13d   : > { %v999_v3 = vsub.f32 %v994_v43, %v3081_v52 }
 0x13f   : > { %v1001_v11 = vmul.f32 %v1000_v54, %v999_v3 }
 0x141   : > { %v2801_v4 = vadd.f32 %v1001_v11, %v3081_v52 }
 0x143   : > { %1036 = vmatmul.f32.vlgmr.msra.gmra.mxu0 %v2801_v4  ;;  %1056 = vmatmul.f32.vlgmr.msra.gmra.mxu1 %v2801_v4  ;;  %1007 = vst [vmem:[%s1006_s3] sm:$0xff] %v2801_v4 }
 0x144   : > { %1076 = vmatmul.f32.vlgmr.msra.gmra.mxu2 %v2801_v4  ;;  %1096 = vmatmul.f32.vlgmr.msra.gmra.mxu3 %v2801_v4 }
 0x145   : > { %1363 = vmatpush.msra.mxu0 %v2413_v9  ;;  %1383 = vmatpush.msra.mxu1 %v2416_v10  ;;  %v3088_v9 = vld [vmem:[#allocation33_spill] sm:$0xff]  ;;  %v3089_v10 = vld [vmem:[#allocation24_spill] sm:$0xff] }
 0x146   : > { %1403 = vmatpush.msra.mxu2 %v2389_v1  ;;  %1423 = vmatpush.msra.mxu3 %v2392_v2  ;;  %v3082_v1 = vld [vmem:[#allocation21_spill] sm:$0xff]  ;;  %v3083_v2 = vld [vmem:[#allocation28_spill] sm:$0xff] }
 0x147   : > { %1364 = vmatpush.msra.mxu0 %v2430_v14  ;;  %1384 = vmatpush.msra.mxu1 %v2433_v15  ;;  %v3092_v14 = vld [vmem:[#allocation37_spill] sm:$0xff]  ;;  %v3093_v15 = vld [vmem:[#allocation26_spill] sm:$0xff] }
 0x148   : > { %1404 = vmatpush.msra.mxu2 %v2397_v5  ;;  %1424 = vmatpush.msra.mxu3 %v2400_v6  ;;  %v3084_v5 = vld [vmem:[#allocation29_spill] sm:$0xff]  ;;  %v3085_v6 = vld [vmem:[#allocation22_spill] sm:$0xff] }
 0x149   : > { %1365 = vmatpush.msra.mxu0 %v2444_v18  ;;  %1385 = vmatpush.msra.mxu1 %v2447_v19  ;;  %v3097_v18 = vld [vmem:[#allocation41_spill] sm:$0xff]  ;;  %v3098_v19 = vld [vmem:[#allocation30_spill] sm:$0xff] }
 0x14a   : > { %1405 = vmatpush.msra.mxu2 %v2405_v7  ;;  %1425 = vmatpush.msra.mxu3 %v2408_v8  ;;  %v3086_v7 = vld [vmem:[#allocation23_spill] sm:$0xff]  ;;  %v3087_v8 = vld [vmem:[#allocation32_spill] sm:$0xff] }
 0x14b   : > { %1366 = vmatpush.msra.mxu0 %v2462_v22  ;;  %1386 = vmatpush.msra.mxu1 %v2465_v23  ;;  %v3101_v22 = vld [vmem:[#allocation44_spill] sm:$0xff]  ;;  %v3102_v23 = vld [vmem:[#allocation34_spill] sm:$0xff] }
 0x14c   : > { %1406 = vmatpush.msra.mxu2 %v2422_v12  ;;  %1426 = vmatpush.msra.mxu3 %v2425_v13  ;;  %v3090_v12 = vld [vmem:[#allocation25_spill] sm:$0xff]  ;;  %v3091_v13 = vld [vmem:[#allocation36_spill] sm:$0xff] }
 0x14d   : > { %1367 = vmatpush.msra.mxu0 %v2479_v27  ;;  %1387 = vmatpush.msra.mxu1 %v2482_v28  ;;  %v3105_v27 = vld [vmem:[#allocation46_spill] sm:$0xff] }
 0x14e   : > { %1407 = vmatpush.msra.mxu2 %v2436_v16  ;;  %1427 = vmatpush.msra.mxu3 %v2439_v17  ;;  %v3095_v16 = vld [vmem:[#allocation27_spill] sm:$0xff]  ;;  %v3096_v17 = vld [vmem:[#allocation40_spill] sm:$0xff]  ;;  %v3106_v28 = vld [vmem:[#allocation38_spill] sm:$0xff] }
 0x14f   : > { %1368 = vmatpush.msra.mxu0 %v2493_v31  ;;  %1388 = vmatpush.msra.mxu1 %v2496_v32  ;;  %v1017_v32 = vld [vmem:[%s1015_s19 + $0x8] sm:$0xff] }
 0x150   : > { %1408 = vmatpush.msra.mxu2 %v2452_v20  ;;  %1428 = vmatpush.msra.mxu3 %v2455_v21  ;;  %v3099_v20 = vld [vmem:[#allocation31_spill] sm:$0xff] }
 0x151   : > { %1369 = vmatpush.msra.mxu0 %v2509_v35  ;;  %1389 = vmatpush.msra.mxu1 %v2512_v36  ;;  %v3100_v21 = vld [vmem:[#allocation43_spill] sm:$0xff] }
 0x152   : > { %1409 = vmatpush.msra.mxu2 %v2470_v24  ;;  %1429 = vmatpush.msra.mxu3 %v2473_v25  ;;  %v3103_v24 = vld [vmem:[#allocation35_spill] sm:$0xff]  ;;  %v3104_v25 = vld [vmem:[#allocation45_spill] sm:$0xff] }
 0x153   : > { %1370 = vmatpush.msra.mxu0 %v2527_v39  ;;  %1390 = vmatpush.msra.mxu1 %v2530_v40 }
 0x154   : > { %1410 = vmatpush.msra.mxu2 %v2487_v29  ;;  %1430 = vmatpush.msra.mxu3 %v2490_v30  ;;  %v3107_v29 = vld [vmem:[#allocation39_spill] sm:$0xff] }
 0x155   : > { %1371 = vmatpush.msra.mxu0 %v2544_v44  ;;  %1391 = vmatpush.msra.mxu1 %v2547_v45  ;;  %v1016_v30 = vld [vmem:[%s1015_s19] sm:$0xff]  ;;  %s1850_s19 = sshll.u32 %s1354_s27, 5 }
 0x156   : > { %1411 = vmatpush.msra.mxu2 %v2501_v33  ;;  %1431 = vmatpush.msra.mxu3 %v2504_v34  ;;  %s1358_s24 = scalar_lea.vmem [#allocation2], %s1850_s19 }
 0x157   : > { %1372 = vmatpush.msra.mxu0 %v2558_v48  ;;  %1392 = vmatpush.msra.mxu1 %v2561_v49 }
 0x158   : > { %1412 = vmatpush.msra.mxu2 %v2517_v37  ;;  %1432 = vmatpush.msra.mxu3 %v3082_v1 }
 0x159   : > { %1373 = vmatpush.msra.mxu0 %v3083_v2  ;;  %1393 = vmatpush.msra.mxu1 %v3084_v5  ;;  %v1005_v5 = vadd.f32 %v2794_v60, %v2790_v41 }
 0x15a   : > { %1413 = vmatpush.msra.mxu2 %v3085_v6  ;;  %1433 = vmatpush.msra.mxu3 %v3086_v7 }
 0x15b   : > { %1374 = vmatpush.msra.mxu0 %v3087_v8  ;;  %1394 = vmatpush.msra.mxu1 %v3088_v9 }
 0x15c   : > { %1414 = vmatpush.msra.mxu2 %v3089_v10  ;;  %1434 = vmatpush.msra.mxu3 %v3090_v12 }
 0x15d   : > { %1375 = vmatpush.msra.mxu0 %v3091_v13  ;;  %1395 = vmatpush.msra.mxu1 %v3092_v14 }
 0x15e   : > { %1415 = vmatpush.msra.mxu2 %v3093_v15  ;;  %1435 = vmatpush.msra.mxu3 %v3095_v16 }
 0x15f   : > { %1376 = vmatpush.msra.mxu0 %v3096_v17  ;;  %1396 = vmatpush.msra.mxu1 %v3097_v18 }
 0x160   : > { %1416 = vmatpush.msra.mxu2 %v3098_v19  ;;  %1436 = vmatpush.msra.mxu3 %v3099_v20  ;;  %v1172_v19 = vstv %s1170_s1  ;;  %s1513_s1 = scvt.s32.f32 %s1512_s21 }
 0x161   : > { %1377 = vmatpush.msra.mxu0 %v3100_v21  ;;  %1397 = vmatpush.msra.mxu1 %v3101_v22 }
 0x162   : > { %1417 = vmatpush.msra.mxu2 %v3102_v23  ;;  %1437 = vmatpush.msra.mxu3 %v3103_v24 }
 0x163   : > { %1378 = vmatpush.msra.mxu0 %v3104_v25  ;;  %1398 = vmatpush.msra.mxu1 %v3105_v27 }
 0x164   : > { %1418 = vmatpush.msra.mxu2 %v3106_v28  ;;  %1438 = vmatpush.msra.mxu3 %v3107_v29 }
 0x1c0   : > { %v1037_v31 = vpop.f32.mrf.mxu0  ;;  %v1057_v33 = vpop.f32.mrf.mxu1 }
 0x1c1   : > { %v1100_v34 = vadd.f32 %v1037_v31, %v1016_v30  ;;  %v1101_v35 = vadd.f32 %v1057_v33, %v1017_v32  ;;  %v1189_v33 = vld [vmem:[%s1187_s13 + $0x8] sm:$0xff] }
 0x1c3   : > { %v1827_v36 = vmul.f32 -1.442695, %v1100_v34  ;;  %v1828_v37 = vmul.f32 -1.442695, %v1101_v35 }
 0x1c5   : > { %1946 = vpow2.f32 %v1827_v36 }
 0x1c6   : > { %1948 = vpow2.f32 %v1828_v37 }
 0x1c7   : > { %v1077_v39 = vpop.f32.mrf.mxu2  ;;  %v1097_v61 = vpop.f32.mrf.mxu3 }
 0x1c8   : > { %v1102_v40 = vadd.f32 %v1077_v39, %v1018_v38  ;;  %v1103_v0 = vadd.f32 %v1097_v61, %v1019_v55  ;;  %v1190_v39 = vld [vmem:[%s1187_s13 + $0x10] sm:$0xff] }
 0x1ca   : > { %v1829_v44 = vmul.f32 -1.442695, %v1102_v40 }
 0x1cb   : > { %v1947_v45 = vpop.eup %1946 }
 0x1cc   : > { %v1949_v48 = vpop.eup %1948  ;;  %v1113_v49 = vadd.f32 1.0, %v1947_v45  ;;  %1950 = vpow2.f32 %v1829_v44 }
 0x1cd   : > { %v1114_v63 = vadd.f32 1.0, %v1949_v48 }
 0x1ce   : > { %1952 = vrcp.f32 %v1113_v49  ;;  %v1127_v46 = vand.u32 2147483648, %v1113_v49  ;;  %v1125_v57 = vand.u32 2147483647, %v1113_v49  ;;  %vm1121_vm14 = vweird.f32 %v1113_v49 }
 0x1cf   : > { %1954 = vrcp.f32 %v1114_v63  ;;  %v1142_v42 = vand.u32 2147483648, %v1114_v63  ;;  %v1140_v43 = vand.u32 2147483647, %v1114_v63  ;;  %vm1136_vm15 = vweird.f32 %v1114_v63 }
 0x1d0   : > { %v1128_v1 = vor.u32 1.1754944e-38, %v1127_v46  ;;  %vm1126_vm2 = vcmp.eq.f32.partialorder %v1125_v57, 8.507059e+37 }
 0x1d1   : > { %v1143_v6 = vor.u32 1.1754944e-38, %v1142_v42  ;;  %vm1141_vm3 = vcmp.eq.f32.partialorder %v1140_v43, 8.507059e+37 }
 0x1d2   : > { %v1951_v58 = vpop.eup %1950 }
 0x1d3   : > { %v1115_v47 = vadd.f32 1.0, %v1951_v58 }
 0x1d4   : > { %v1953_v26 = vpop.eup %1952 }
 0x1d5   : > { %v1955_v59 = vpop.eup %1954  ;;  %v1117_v62 = vmul.f32 %v1953_v26, %v1113_v49  ;;  %1956 = vrcp.f32 %v1115_v47  ;;  %vm1122_vm12 = vweird.f32 %v1953_v26  ;;  %v1157_v20 = vand.u32 2147483648, %v1115_v47 }
 0x1d6   : > { %v1132_v54 = vmul.f32 %v1955_v59, %v1114_v63  ;;  %1958 = vtanh.f32 %v1103_v0  ;;  %vm1137_vm13 = vweird.f32 %v1955_v59  ;;  %vm1123_vm0 = vmor %vm1121_vm14, %vm1122_vm12  ;;  %vm1151_vm5 = vweird.f32 %v1115_v47 }
 0x1d7   : > { %v1118_v51 = vsub.f32 1.0, %v1117_v62  ;;  %vm1138_vm1 = vmor %vm1136_vm15, %vm1137_vm13  ;;  %v1155_v60 = vand.u32 2147483647, %v1115_v47  ;;  %v1158_v23 = vor.u32 1.1754944e-38, %v1157_v20 }
 0x1d8   : > { %v1133_v50 = vsub.f32 1.0, %v1132_v54 }
 0x1d9   : > { %v1119_v53 = vmul.f32 %v1953_v26, %v1118_v51  ;;  %vm1156_vm7 = vcmp.eq.f32.partialorder %v1155_v60, 8.507059e+37 }
 0x1da   : > { %v1134_v56 = vmul.f32 %v1955_v59, %v1133_v50 }
 0x1db   : > { %v1957_v52 = vpop.eup %1956  ;;  %v1120_v3 = vadd.f32 %v1953_v26, %v1119_v53 }
 0x1dc   : > { %v1147_v11 = vmul.f32 %v1957_v52, %v1115_v47  ;;  %v1135_v2 = vadd.f32 %v1955_v59, %v1134_v56  ;;  %v1959_v8 = vpop.eup %1958  ;;  %vm1152_vm4 = vweird.f32 %v1957_v52 }
 0x1dd   : > { %v1124_v7 = vsel %vm1123_vm0, %v1953_v26, %v1120_v3  ;;  %vm1153_vm6 = vmor %vm1151_vm5, %vm1152_vm4  ;;  %v1191_v26 = vld [vmem:[%s1187_s13 + $0x18] sm:$0xff] }
 0x1de   : > { %v1148_v9 = vsub.f32 1.0, %v1147_v11  ;;  %v1129_v10 = vsel %vm1126_vm2, %v1128_v1, %v1124_v7  ;;  %v1139_v12 = vsel %vm1138_vm1, %v1955_v59, %v1135_v2 }
 0x1df   : > { %v1144_v13 = vsel %vm1141_vm3, %v1143_v6, %v1139_v12  ;;  %v1163_v14 = vmul.f32 %v1959_v8, %v1129_v10 }
 0x1e0   : > { %v1149_v15 = vmul.f32 %v1957_v52, %v1148_v9  ;;  %v1162_v16 = vmul.f32 %v1144_v13, %v1005_v5 }
 0x1e2   : > { %v1164_v17 = vadd.f32 %v1163_v14, %v1162_v16  ;;  %v1150_v18 = vadd.f32 %v1957_v52, %v1149_v15 }
 0x1e4   : > { %1960 = vtanh.f32 %v1164_v17  ;;  %v1175_v41 = vsub.f32 %v1164_v17, %v1005_v5  ;;  %v1154_v22 = vsel %vm1153_vm6, %v1957_v52, %v1150_v18 }
 0x1e5   : > { %v1159_v27 = vsel %vm1156_vm7, %v1158_v23, %v1154_v22 }
 0x1e6   : > { %v1176_v21 = vmul.f32 %v1175_v41, %v1172_v19 }
 0x1e8   : > { %v2889_v24 = vadd.f32 %v1176_v21, %v1005_v5 }
 0x1ea   : > { %v1961_v25 = vpop.eup %1960 }
 0x1eb   : > { %v1166_v28 = vmul.f32 %v1961_v25, %v1159_v27 }
 0x1ed   : > { %v1171_v29 = vsub.f32 %v1166_v28, %v2801_v4 }
 0x1ef   : > { %v1173_v30 = vmul.f32 %v1172_v19, %v1171_v29  ;;  %v1344_v19 = vstv %s1342_s15 }
 0x1f1   : > { %v2896_v31 = vadd.f32 %v1173_v30, %v2801_v4  ;;  %v1188_v4 = vld [vmem:[%s1187_s13] sm:$0xff] }
 0x1f3   : > { %1208 = vmatmul.f32.vlgmr.msrb.gmra.mxu0 %v2896_v31  ;;  %1228 = vmatmul.f32.vlgmr.msrb.gmra.mxu1 %v2896_v31  ;;  %1179 = vst [vmem:[%s1178_s2] sm:$0xff] %v2896_v31  ;;  %s1521_s2 = scalar_lea.vmem %s2322_s29, %s1353_s23 }
 0x1f4   : > { %1248 = vmatmul.f32.vlgmr.msrb.gmra.mxu2 %v2896_v31  ;;  %1268 = vmatmul.f32.vlgmr.msrb.gmra.mxu3 %v2896_v31 }
 0x270   : > { %v1209_v32 = vpop.f32.mrf.mxu0  ;;  %v1229_v34 = vpop.f32.mrf.mxu1 }
 0x271   : > { %v1272_v35 = vadd.f32 %v1209_v32, %v1188_v4  ;;  %v1273_v36 = vadd.f32 %v1229_v34, %v1189_v33  ;;  %v1360_v34 = vld [vmem:[%s1358_s24 + $0x8] sm:$0xff] }
 0x273   : > { %v1834_v37 = vmul.f32 -1.442695, %v1272_v35  ;;  %v1835_v38 = vmul.f32 -1.442695, %v1273_v36 }
 0x275   : > { %1962 = vpow2.f32 %v1834_v37 }
 0x276   : > { %1964 = vpow2.f32 %v1835_v38 }
 0x277   : > { %v1249_v40 = vpop.f32.mrf.mxu2  ;;  %v1269_v58 = vpop.f32.mrf.mxu3 }
 0x278   : > { %v1274_v44 = vadd.f32 %v1249_v40, %v1190_v39  ;;  %v1275_v59 = vadd.f32 %v1269_v58, %v1191_v26  ;;  %v1361_v39 = vld [vmem:[%s1358_s24 + $0x10] sm:$0xff]  ;;  %v1362_v26 = vld [vmem:[%s1358_s24 + $0x18] sm:$0xff] }
 0x27a   : > { %v1836_v45 = vmul.f32 -1.442695, %v1274_v44 }
 0x27b   : > { %v1963_v48 = vpop.eup %1962 }
 0x27c   : > { %v1965_v49 = vpop.eup %1964  ;;  %v1285_v63 = vadd.f32 1.0, %v1963_v48  ;;  %1966 = vpow2.f32 %v1836_v45 }
 0x27d   : > { %v1286_v61 = vadd.f32 1.0, %v1965_v49 }
 0x27e   : > { %1968 = vrcp.f32 %v1285_v63  ;;  %v1299_v42 = vand.u32 2147483648, %v1285_v63  ;;  %v1297_v56 = vand.u32 2147483647, %v1285_v63  ;;  %vm1293_vm10 = vweird.f32 %v1285_v63 }
 0x27f   : > { %1970 = vrcp.f32 %v1286_v61  ;;  %v1314_v53 = vand.u32 2147483648, %v1286_v61  ;;  %v1312_v52 = vand.u32 2147483647, %v1286_v61  ;;  %vm1308_vm11 = vweird.f32 %v1286_v61 }
 0x280   : > { %v1300_v2 = vor.u32 1.1754944e-38, %v1299_v42  ;;  %vm1298_vm14 = vcmp.eq.f32.partialorder %v1297_v56, 8.507059e+37 }
 0x281   : > { %v1315_v6 = vor.u32 1.1754944e-38, %v1314_v53  ;;  %vm1313_vm15 = vcmp.eq.f32.partialorder %v1312_v52, 8.507059e+37 }
 0x282   : > { %v1967_v47 = vpop.eup %1966 }
 0x283   : > { %v1287_v55 = vadd.f32 1.0, %v1967_v47 }
 0x284   : > { %v1969_v0 = vpop.eup %1968 }
 0x285   : > { %v1971_v62 = vpop.eup %1970  ;;  %v1289_v54 = vmul.f32 %v1969_v0, %v1285_v63  ;;  %1972 = vrcp.f32 %v1287_v55  ;;  %vm1294_vm8 = vweird.f32 %v1969_v0  ;;  %v1329_v20 = vand.u32 2147483648, %v1287_v55 }
 0x286   : > { %v1304_v51 = vmul.f32 %v1971_v62, %v1286_v61  ;;  %1974 = vtanh.f32 %v1275_v59  ;;  %vm1309_vm9 = vweird.f32 %v1971_v62  ;;  %vm1295_vm12 = vmor %vm1293_vm10, %vm1294_vm8  ;;  %vm1323_vm1 = vweird.f32 %v1287_v55 }
 0x287   : > { %v1290_v50 = vsub.f32 1.0, %v1289_v54  ;;  %vm1310_vm13 = vmor %vm1308_vm11, %vm1309_vm9  ;;  %v1327_v60 = vand.u32 2147483647, %v1287_v55  ;;  %v1330_v23 = vor.u32 1.1754944e-38, %v1329_v20 }
 0x288   : > { %v1305_v46 = vsub.f32 1.0, %v1304_v51 }
 0x289   : > { %v1291_v57 = vmul.f32 %v1969_v0, %v1290_v50  ;;  %vm1328_vm3 = vcmp.eq.f32.partialorder %v1327_v60, 8.507059e+37 }
 0x28a   : > { %v1306_v43 = vmul.f32 %v1971_v62, %v1305_v46 }
 0x28b   : > { %v1973_v3 = vpop.eup %1972  ;;  %v1292_v11 = vadd.f32 %v1969_v0, %v1291_v57 }
 0x28c   : > { %v1319_v1 = vmul.f32 %v1973_v3, %v1287_v55  ;;  %v1307_v5 = vadd.f32 %v1971_v62, %v1306_v43  ;;  %v1975_v8 = vpop.eup %1974  ;;  %vm1324_vm0 = vweird.f32 %v1973_v3 }
 0x28d   : > { %v1296_v7 = vsel %vm1295_vm12, %v1969_v0, %v1292_v11  ;;  %vm1325_vm2 = vmor %vm1323_vm1, %vm1324_vm0 }
 0x28e   : > { %v1320_v9 = vsub.f32 1.0, %v1319_v1  ;;  %v1301_v10 = vsel %vm1298_vm14, %v1300_v2, %v1296_v7  ;;  %v1311_v12 = vsel %vm1310_vm13, %v1971_v62, %v1307_v5 }
 0x28f   : > { %v1316_v13 = vsel %vm1313_vm15, %v1315_v6, %v1311_v12  ;;  %v1335_v14 = vmul.f32 %v1975_v8, %v1301_v10 }
 0x290   : > { %v1321_v15 = vmul.f32 %v1973_v3, %v1320_v9  ;;  %v1334_v16 = vmul.f32 %v1316_v13, %v2889_v24 }
 0x292   : > { %v1336_v17 = vadd.f32 %v1335_v14, %v1334_v16  ;;  %v1322_v18 = vadd.f32 %v1973_v3, %v1321_v15 }
 0x294   : > { %1976 = vtanh.f32 %v1336_v17  ;;  %v1347_v41 = vsub.f32 %v1336_v17, %v2889_v24  ;;  %v1326_v22 = vsel %vm1325_vm2, %v1973_v3, %v1322_v18 }
 0x295   : > { %v1331_v28 = vsel %vm1328_vm3, %v1330_v23, %v1326_v22 }
 0x296   : > { %v1348_v21 = vmul.f32 %v1347_v41, %v1344_v19 }
 0x298   : > { %v2921_v25 = vadd.f32 %v1348_v21, %v2889_v24  ;;  %v1359_v24 = vld [vmem:[%s1358_s24] sm:$0xff] }
 0x29a   : > { %v1977_v27 = vpop.eup %1976 }
 0x29b   : > { %v1338_v29 = vmul.f32 %v1977_v27, %v1331_v28 }
 0x29d   : > { %v1343_v30 = vsub.f32 %v1338_v29, %v2896_v31 }
 0x29f   : > { %v1345_v4 = vmul.f32 %v1344_v19, %v1343_v30  ;;  %v1515_v19 = vstv %s1513_s1 }
 0x2a1   : > { %v2928_v32 = vadd.f32 %v1345_v4, %v2896_v31 }
 0x2a3   : > { %1379 = vmatmul.f32.vlgmr.msra.gmra.mxu0 %v2928_v32  ;;  %1399 = vmatmul.f32.vlgmr.msra.gmra.mxu1 %v2928_v32  ;;  %1351 = vst [vmem:[%s1350_s20] sm:$0xff] %v2928_v32 }
 0x2a4   : > { %1419 = vmatmul.f32.vlgmr.msra.gmra.mxu2 %v2928_v32  ;;  %1439 = vmatmul.f32.vlgmr.msra.gmra.mxu3 %v2928_v32 }
 0x320   : > { %v1380_v33 = vpop.f32.mrf.mxu0  ;;  %v1400_v31 = vpop.f32.mrf.mxu1 }
 0x321   : > { %v1443_v35 = vadd.f32 %v1380_v33, %v1359_v24  ;;  %v1444_v36 = vadd.f32 %v1400_v31, %v1360_v34 }
 0x323   : > { %v1839_v37 = vmul.f32 -1.442695, %v1443_v35  ;;  %v1840_v38 = vmul.f32 -1.442695, %v1444_v36 }
 0x325   : > { %1978 = vpow2.f32 %v1839_v37 }
 0x326   : > { %1980 = vpow2.f32 %v1840_v38 }
 0x327   : > { %v1420_v40 = vpop.f32.mrf.mxu2  ;;  %v1440_v58 = vpop.f32.mrf.mxu3 }
 0x328   : > { %v1445_v44 = vadd.f32 %v1420_v40, %v1361_v39  ;;  %v1446_v59 = vadd.f32 %v1440_v58, %v1362_v26 }
 0x32a   : > { %v1841_v45 = vmul.f32 -1.442695, %v1445_v44 }
 0x32b   : > { %v1979_v48 = vpop.eup %1978 }
 0x32c   : > { %v1981_v49 = vpop.eup %1980  ;;  %v1456_v63 = vadd.f32 1.0, %v1979_v48  ;;  %1982 = vpow2.f32 %v1841_v45 }
 0x32d   : > { %v1457_v61 = vadd.f32 1.0, %v1981_v49 }
 0x32e   : > { %1984 = vrcp.f32 %v1456_v63  ;;  %v1470_v42 = vand.u32 2147483648, %v1456_v63  ;;  %v1468_v56 = vand.u32 2147483647, %v1456_v63  ;;  %vm1464_vm6 = vweird.f32 %v1456_v63 }
 0x32f   : > { %1986 = vrcp.f32 %v1457_v61  ;;  %v1485_v53 = vand.u32 2147483648, %v1457_v61  ;;  %v1483_v52 = vand.u32 2147483647, %v1457_v61  ;;  %vm1479_vm7 = vweird.f32 %v1457_v61 }
 0x330   : > { %v1471_v2 = vor.u32 1.1754944e-38, %v1470_v42  ;;  %vm1469_vm10 = vcmp.eq.f32.partialorder %v1468_v56, 8.507059e+37 }
 0x331   : > { %v1486_v6 = vor.u32 1.1754944e-38, %v1485_v53  ;;  %vm1484_vm11 = vcmp.eq.f32.partialorder %v1483_v52, 8.507059e+37 }
 0x332   : > { %v1983_v47 = vpop.eup %1982 }
 0x333   : > { %v1458_v55 = vadd.f32 1.0, %v1983_v47 }
 0x334   : > { %v1985_v0 = vpop.eup %1984 }
 0x335   : > { %v1987_v62 = vpop.eup %1986  ;;  %v1460_v54 = vmul.f32 %v1985_v0, %v1456_v63  ;;  %1988 = vrcp.f32 %v1458_v55  ;;  %vm1465_vm4 = vweird.f32 %v1985_v0  ;;  %v1500_v20 = vand.u32 2147483648, %v1458_v55 }
 0x336   : > { %v1475_v51 = vmul.f32 %v1987_v62, %v1457_v61  ;;  %1990 = vtanh.f32 %v1446_v59  ;;  %vm1480_vm5 = vweird.f32 %v1987_v62  ;;  %vm1466_vm8 = vmor %vm1464_vm6, %vm1465_vm4  ;;  %vm1494_vm13 = vweird.f32 %v1458_v55 }
 0x337   : > { %v1461_v50 = vsub.f32 1.0, %v1460_v54  ;;  %vm1481_vm9 = vmor %vm1479_vm7, %vm1480_vm5  ;;  %v1498_v60 = vand.u32 2147483647, %v1458_v55  ;;  %v1501_v23 = vor.u32 1.1754944e-38, %v1500_v20 }
 0x338   : > { %v1476_v46 = vsub.f32 1.0, %v1475_v51 }
 0x339   : > { %v1462_v57 = vmul.f32 %v1985_v0, %v1461_v50  ;;  %vm1499_vm15 = vcmp.eq.f32.partialorder %v1498_v60, 8.507059e+37 }
 0x33a   : > { %v1477_v43 = vmul.f32 %v1987_v62, %v1476_v46 }
 0x33b   : > { %v1989_v3 = vpop.eup %1988  ;;  %v1463_v11 = vadd.f32 %v1985_v0, %v1462_v57 }
 0x33c   : > { %v1490_v1 = vmul.f32 %v1989_v3, %v1458_v55  ;;  %v1478_v5 = vadd.f32 %v1987_v62, %v1477_v43  ;;  %v1991_v8 = vpop.eup %1990  ;;  %vm1495_vm12 = vweird.f32 %v1989_v3 }
 0x33d   : > { %v1467_v7 = vsel %vm1466_vm8, %v1985_v0, %v1463_v11  ;;  %vm1496_vm14 = vmor %vm1494_vm13, %vm1495_vm12 }
 0x33e   : > { %v1491_v9 = vsub.f32 1.0, %v1490_v1  ;;  %v1472_v10 = vsel %vm1469_vm10, %v1471_v2, %v1467_v7  ;;  %v1482_v12 = vsel %vm1481_vm9, %v1987_v62, %v1478_v5 }
 0x33f   : > { %v1487_v13 = vsel %vm1484_vm11, %v1486_v6, %v1482_v12  ;;  %v1506_v14 = vmul.f32 %v1991_v8, %v1472_v10 }
 0x340   : > { %v1492_v15 = vmul.f32 %v1989_v3, %v1491_v9  ;;  %v1505_v16 = vmul.f32 %v1487_v13, %v2921_v25 }
 0x342   : > { %v1507_v17 = vadd.f32 %v1506_v14, %v1505_v16  ;;  %v1493_v18 = vadd.f32 %v1989_v3, %v1492_v15 }
 0x344   : > { %1992 = vtanh.f32 %v1507_v17  ;;  %v1518_v41 = vsub.f32 %v1507_v17, %v2921_v25  ;;  %v1497_v22 = vsel %vm1496_vm14, %v1989_v3, %v1493_v18 }
 0x345   : > { %v1502_v29 = vsel %vm1499_vm15, %v1501_v23, %v1497_v22 }
 0x346   : > { %v1519_v21 = vmul.f32 %v1518_v41, %v1515_v19 }
 0x348   : > { %v1520_v27 = vadd.f32 %v1519_v21, %v2921_v25 }
 0x34a   : > { %v1993_v28 = vpop.eup %1992  ;;  %1524 = vst [vmem:[#allocation4] sm:$0xff] %v1520_v27 }
 0x34b   : > { %v1509_v30 = vmul.f32 %v1993_v28, %v1502_v29 }
 0x34d   : > { %v1514_v4 = vsub.f32 %v1509_v30, %v2928_v32 }
 0x34f   : > { %v1516_v24 = vmul.f32 %v1515_v19, %v1514_v4 }
 0x350   : > { %1528 = sbr.rel (%p1842_p7) target bundleno = 855 (0x357), region = 60 }
 0x351   : > { %v1517_v33 = vadd.f32 %v1516_v24, %v2928_v32 }
 0x353   : > { %1522 = vst [vmem:[%s1521_s2] sm:$0xff] %v1517_v33 }
 0x354   : > { %1523 = vst [vmem:[#allocation3] sm:$0xff] %v1517_v33 }
 0x355   : > { %1529 = vst [vmem:[%s542_s28] sm:$0xff] %v1517_v33 }
 0x356   : > { %1530 = vst [vmem:[%s546_s22] sm:$0xff] %v1520_v27 }
 0x357 PF: > { %s3110_s29 = sld [smem:[#allocation15_spill]] }
 0x358   : > { %s3111_s27 = sld [smem:[#allocation11_spill]] }
 0x359   : > { %s3112_s28 = sld [smem:[#allocation12_spill]] }
 0x35a   : > { %s3114_s30 = sld [smem:[#allocation13_spill]] }
 0x35b   : > { %s3115_s9 = sld [smem:[#allocation14_spill]] }
 0x35c   : > { %s3116_s10 = sld [smem:[#allocation16_spill]] }
 0x35d   : > { %s25_s12 = sadd.s32 1, %s3110_s29   ;;  %s3113_s29 = sld [smem:[#allocation18_spill]] }
 0x35e   : > { %p22_p8 = scmp.ge.s32.totalorder %s25_s12, 8   ;;  %s3117_s11 = sld [smem:[#allocation17_spill]] }
 0x360   :  { %24 = sbr.rel (!%p22_p8) target bundleno = 12 (0xc), region = 149 }
 0x365   :  { %1604 = vsyncpa [#allocation6], 1 }
 0x366   :  { %1606 = vsyncpa [#allocation6 + $0x1], 1 }
 0x367   :  { %1607 = vsyncpa [#allocation8], 1 }
 0x368   :  { %1609 = vsyncpa [#allocation8 + $0x1], 1 }

</bundles_post_ra>
